<compile_context>
chip_gen: v6e
topology: v6e:2x2x1
jax: 0.10.0
libtpu: 0.0.40
codegen_flags: <defaults>
</compile_context>

<pallas_src>
import functools
import math

import jax
import jax.numpy as jnp
from jax import lax
from jax.experimental import pallas as pl
from jax.experimental.pallas import tpu as pltpu

EPS = 1e-8
LN_EPS = 1e-5

# 48 MiB scoped VMEM: below v7x's 64 MiB physical, above v5e/v6e scoped defaults.
# TODO(synk): bump to ~96 MiB on v5e/v6e (via pltpu.get_tpu_info) for large shapes.
VMEM_LIMIT = 48 * 1024 * 1024

# f32 keeps the kernel inside a tight parity bar vs the f32 reference at the
# test shapes; switch to jnp.bfloat16 for production MXU throughput.
MATMUL_DTYPE = jnp.float32


def _fit(dim, pref):
    """Largest tile <= pref that divides dim (prefer multiples of 128)."""
    pref = min(pref, dim)
    if pref <= 0:
        return dim
    if dim % pref == 0:
        return pref
    start = pref - (pref % 128)
    for d in range(start, 0, -128):
        if d > 0 and dim % d == 0:
            return d
    for d in range(pref, 0, -1):
        if dim % d == 0:
            return d
    return dim


# ----------------------------------------------------------------------------
# Tiled matmul kernel (f32 accumulation in VMEM scratch)
# ----------------------------------------------------------------------------
def _matmul_kernel(x_ref, w_ref, o_ref, acc_ref):
    @pl.when(pl.program_id(2) == 0)
    def _():
        acc_ref[...] = jnp.zeros_like(acc_ref)

    acc_ref[...] += jnp.dot(x_ref[...], w_ref[...],
                            preferred_element_type=jnp.float32)

    @pl.when(pl.program_id(2) == pl.num_programs(2) - 1)
    def _():
        o_ref[...] = acc_ref[...].astype(o_ref.dtype)


def tiled_matmul(x, w, out_dtype=jnp.float32, tm=256, tn=256, tk=512):
    """x: (M, K) @ w: (K, N) -> (M, N), tiled with an f32 accumulator."""
    M, K = x.shape
    K2, N = w.shape
    assert K == K2
    tm, tn, tk = _fit(M, tm), _fit(N, tn), _fit(K, tk)
    grid = (M // tm, N // tn, K // tk)
    return pl.pallas_call(
        _matmul_kernel,
        out_shape=jax.ShapeDtypeStruct((M, N), out_dtype),
        grid=grid,
        in_specs=[pl.BlockSpec((tm, tk), lambda i, j, k: (i, k)),
                  pl.BlockSpec((tk, tn), lambda i, j, k: (k, j))],
        out_specs=pl.BlockSpec((tm, tn), lambda i, j, k: (i, j)),
        scratch_shapes=[pltpu.VMEM((tm, tn), jnp.float32)],
        compiler_params=pltpu.CompilerParams(
            dimension_semantics=("parallel", "parallel", "arbitrary"),
            vmem_limit_bytes=VMEM_LIMIT),
    )(x, w)


# ----------------------------------------------------------------------------
# Flash-style mLSTM cell + MultiHeadLayerNorm over a TRIANGULAR (qi, ki) grid.
#   grid = (B, n_tri) where n_tri = nT*(nT+1)/2; the (qi, ki) pair for each
#   step is looked up from two scalar-prefetched tables, so fully-masked kv
#   tiles are never scheduled (no DMA, no grid-step overhead).
#   Running max m, running signed sum l and the h accumulator live in VMEM.
# ----------------------------------------------------------------------------
def _mlstm_cell_kernel(qi_tab_ref, ki_tab_ref,
                       q_ref, k_ref, v_ref, igmc_ref, csq_ref, gam_ref,
                       o_ref, m_scr, l_scr, acc_scr, *, NH, DH, T):
    t = pl.program_id(1)
    qi = qi_tab_ref[t]
    ki = ki_tab_ref[t]

    @pl.when(ki == 0)
    def _init():
        m_scr[...] = jnp.full_like(m_scr, -jnp.inf)
        l_scr[...] = jnp.zeros_like(l_scr)
        acc_scr[...] = jnp.zeros_like(acc_scr)

    q = q_ref[0]          # (T, NH*DH) f32
    k = k_ref[0]          # (T, NH*DH) f32
    v = v_ref[0]          # (T, NH*DH) f32
    igmc = igmc_ref[0]    # (NH, T)    f32   ig_preact - cumsum(log_fg) (cols)
    csq = csq_ref[0]      # (T, NH)    f32   cumsum(log_fg) (rows)

    row = qi * T + lax.broadcasted_iota(jnp.int32, (T, T), 0)
    col = ki * T + lax.broadcasted_iota(jnp.int32, (T, T), 1)
    causal = row >= col
    inv_sqrt_dh = jnp.float32(1.0 / math.sqrt(DH))

    # TODO(synk): verify in the MLIR dump that the last-dim/last-dim qk
    # contraction does not emit an XLU transpose per head; if it does, feed k
    # pre-transposed (B, inner, S) from glue.
    for h in range(NH):
        hs = slice(h * DH, (h + 1) * DH)
        # log_D[i, j] = cs[i] + (ig[j] - cs[j])   (j <= i), else -inf
        logd = csq[:, h:h + 1] + igmc[h:h + 1, :]
        logd = jnp.where(causal, logd, -jnp.inf)

        m_prev = m_scr[:, h:h + 1]                                   # (T, 1)
        m_new = jnp.maximum(m_prev, jnp.max(logd, axis=-1, keepdims=True))
        alpha = jnp.exp(m_prev - m_new)

        qk = lax.dot_general(q[:, hs], k[:, hs],
                             (((1,), (1,)), ((), ())),
                             preferred_element_type=jnp.float32) * inv_sqrt_dh
        c = qk * jnp.exp(logd - m_new)                               # (T, T)

        l_scr[:, h:h + 1] = (alpha * l_scr[:, h:h + 1]
                             + jnp.sum(c, axis=-1, keepdims=True))
        acc_scr[:, hs] = (alpha * acc_scr[:, hs]
                          + jnp.dot(c.astype(v.dtype), v[:, hs],
                                    preferred_element_type=jnp.float32))
        m_scr[:, h:h + 1] = m_new

    # Last kv tile of this q row (triangular schedule => ki == qi is last).
    @pl.when(ki == qi)
    def _finalize():
        for h in range(NH):
            hs = slice(h * DH, (h + 1) * DH)
            m_h = m_scr[:, h:h + 1]
            l_h = l_scr[:, h:h + 1]
            normaliser = jnp.maximum(jnp.abs(l_h), jnp.exp(-m_h))
            # approx reciprocal: per-row scale error is absorbed by the LN below
            h_tilde = acc_scr[:, hs] * pl.reciprocal(normaliser + EPS, approx=True)
            mu = jnp.mean(h_tilde, axis=-1, keepdims=True)
            xc = h_tilde - mu
            var = jnp.mean(xc * xc, axis=-1, keepdims=True)
            acc_scr[:, hs] = xc * lax.rsqrt(var + LN_EPS)
        # single lane-dense store of all heads, scaled by (1 + outnorm_weight)
        o_ref[0] = acc_scr[...] * gam_ref[...]


def mlstm_cell(q_all, k_all, v_all, ig_minus_cs_col, cs_row, gamma_row,
               *, num_heads, head_dim, t_seq=256):
    B, S, inner = q_all.shape
    NH, DH = num_heads, head_dim
    T = _fit(S, t_seq)
    nT = S // T

    # Triangular schedule: only kv tiles with ki <= qi are ever visited.
    qi_list, ki_list = [], []
    for qi in range(nT):
        for ki in range(qi + 1):
            qi_list.append(qi)
            ki_list.append(ki)
    qi_tab = jnp.asarray(qi_list, dtype=jnp.int32)
    ki_tab = jnp.asarray(ki_list, dtype=jnp.int32)
    n_tri = len(qi_list)

    kern = functools.partial(_mlstm_cell_kernel, NH=NH, DH=DH, T=T)
    return pl.pallas_call(
        kern,
        out_shape=jax.ShapeDtypeStruct((B, S, inner), jnp.float32),
        grid_spec=pltpu.PrefetchScalarGridSpec(
            num_scalar_prefetch=2,
            grid=(B, n_tri),
            in_specs=[
                pl.BlockSpec((1, T, inner), lambda b, t, qt, kt: (b, qt[t], 0)),  # q
                pl.BlockSpec((1, T, inner), lambda b, t, qt, kt: (b, kt[t], 0)),  # k
                pl.BlockSpec((1, T, inner), lambda b, t, qt, kt: (b, kt[t], 0)),  # v
                pl.BlockSpec((1, NH, T),   lambda b, t, qt, kt: (b, 0, kt[t])),   # ig - cs (cols)
                pl.BlockSpec((1, T, NH),   lambda b, t, qt, kt: (b, qt[t], 0)),   # cs (rows)
                pl.BlockSpec((1, inner),   lambda b, t, qt, kt: (0, 0)),          # gamma
            ],
            out_specs=pl.BlockSpec((1, T, inner), lambda b, t, qt, kt: (b, qt[t], 0)),
            scratch_shapes=[pltpu.VMEM((T, NH), jnp.float32),      # running max m
                            pltpu.VMEM((T, NH), jnp.float32),      # running sum(C)
                            pltpu.VMEM((T, inner), jnp.float32)]), # h accumulator
        compiler_params=pltpu.CompilerParams(
            dimension_semantics=("parallel", "arbitrary"),
            vmem_limit_bytes=VMEM_LIMIT),
    )(qi_tab, ki_tab, q_all, k_all, v_all, ig_minus_cs_col, cs_row, gamma_row)


# ----------------------------------------------------------------------------
# skip + output gate (SiLU) + proj_down.
#   grid = (M tiles, K=inner tiles); the full E is kept per block so each
#   h/xc/z tile is read once and the gate math is computed once.
# ----------------------------------------------------------------------------
def _finalize_kernel(h_ref, xc_ref, z_ref, skip_ref, wd_ref, o_ref, acc_ref):
    kk = pl.program_id(1)

    @pl.when(kk == 0)
    def _():
        acc_ref[...] = jnp.zeros_like(acc_ref)

    z = z_ref[...]
    g = (h_ref[...] + skip_ref[...] * xc_ref[...]) * (z * jax.nn.sigmoid(z))
    acc_ref[...] += jnp.dot(g.astype(wd_ref.dtype), wd_ref[...],
                            preferred_element_type=jnp.float32)

    @pl.when(kk == pl.num_programs(1) - 1)
    def _():
        o_ref[...] = acc_ref[...].astype(o_ref.dtype)


def finalize_proj_down(h_flat, xc_flat, z_flat, skip_row, wd_t, tm=256, tk=512):
    M, inner = h_flat.shape
    _, E = wd_t.shape
    tm, tk = _fit(M, tm), _fit(inner, tk)
    grid = (M // tm, inner // tk)
    return pl.pallas_call(
        _finalize_kernel,
        out_shape=jax.ShapeDtypeStruct((M, E), jnp.float32),
        grid=grid,
        in_specs=[
            pl.BlockSpec((tm, tk), lambda m, k: (m, k)),   # h (cell output)
            pl.BlockSpec((tm, tk), lambda m, k: (m, k)),   # x_conv_act
            pl.BlockSpec((tm, tk), lambda m, k: (m, k)),   # z (ogate input)
            pl.BlockSpec((1, tk),  lambda m, k: (0, k)),   # learnable_skip
            pl.BlockSpec((tk, E),  lambda m, k: (k, 0)),   # W_down^T
        ],
        out_specs=pl.BlockSpec((tm, E), lambda m, k: (m, 0)),
        scratch_shapes=[pltpu.VMEM((tm, E), jnp.float32)],
        compiler_params=pltpu.CompilerParams(
            dimension_semantics=("parallel", "arbitrary"),
            vmem_limit_bytes=VMEM_LIMIT),
    )(h_flat, xc_flat, z_flat, skip_row, wd_t)


# ----------------------------------------------------------------------------
# Block-diagonal weight assembly for LinearHeadwiseExpand
# ----------------------------------------------------------------------------
def _block_diag_from_heads(w):
    """w: (NHq, hd_out, hd_in) [einsum 'bshi,hoi->bsho'] -> dense (in, out)."""
    NHq, hd_o, hd_i = w.shape
    wt = jnp.swapaxes(w, 1, 2)                              # (NHq, hd_i, hd_o)
    eye = jnp.eye(NHq, dtype=w.dtype)
    bd = wt[:, None, :, :] * eye[:, :, None, None]          # (g, h, i, o)
    return bd.transpose(0, 2, 1, 3).reshape(NHq * hd_i, NHq * hd_o)


# ----------------------------------------------------------------------------
# mLSTMLayer forward (glue + kernels)
# ----------------------------------------------------------------------------
def mlstm_layer_forward(params, x, cfg):
    B, S, E = x.shape
    inner = cfg["inner_dim"]
    NH = cfg["num_heads"]
    DH = inner // NH
    K = cfg["conv_kernel"]

    # --- proj_up (Pallas tiled matmul) ---
    w_up_t = params["W_up"].T.astype(MATMUL_DTYPE)                # (E, 2*inner)
    x_proj = tiled_matmul(x.reshape(B * S, E).astype(MATMUL_DTYPE), w_up_t,
                          out_dtype=jnp.float32).reshape(B, S, 2 * inner)
    x_mlstm = x_proj[..., :inner]
    z = x_proj[..., inner:]

    # --- causal depthwise conv1d + SiLU (K taps; tiny, kept in XLA glue) ---
    # TODO(synk): depthwise conv, NH-wide gate linears and the (B,S,NH) cumsum
    # stay in XLA glue (negligible work).
    w_conv = params["W_conv"]                                     # (inner, K)
    x_pad = jnp.pad(x_mlstm, ((0, 0), (K - 1, 0), (0, 0)))
    x_conv = jnp.zeros_like(x_mlstm)
    for kk in range(K):
        x_conv = x_conv + x_pad[:, kk:kk + S, :] * w_conv[:, kk][None, None, :]
    x_conv_act = x_conv * jax.nn.sigmoid(x_conv)

    # --- q/k (fused) and v block-diagonal projections on the MXU ---
    # TODO(synk): on v5e, replace the dense block-diagonal matmul by a grouped
    # per-head matmul (only 1/NHq of these FLOPs are useful).
    wq_bd = _block_diag_from_heads(params["W_q"])
    wk_bd = _block_diag_from_heads(params["W_k"])
    wv_bd = _block_diag_from_heads(params["W_v"]).astype(MATMUL_DTYPE)
    wqk_bd = jnp.concatenate([wq_bd, wk_bd], axis=1).astype(MATMUL_DTYPE)
    xca = x_conv_act.reshape(B * S, inner).astype(MATMUL_DTYPE)
    xm = x_mlstm.reshape(B * S, inner).astype(MATMUL_DTYPE)
    qk_all = tiled_matmul(xca, wqk_bd, out_dtype=jnp.float32)     # (M, 2*inner)
    q_all = qk_all[:, :inner].reshape(B, S, inner)
    k_all = qk_all[:, inner:].reshape(B, S, inner)
    v_all = tiled_matmul(xm, wv_bd, out_dtype=jnp.float32).reshape(B, S, inner)

    # --- i/f gate pre-activations: split weights, no (B,S,3*inner) concat ---
    w_ig, w_fg = params["W_ig"], params["W_fg"]
    wig_qk = (w_ig[:, :inner] + w_ig[:, inner:2 * inner]).T
    wig_v = w_ig[:, 2 * inner:].T
    wfg_qk = (w_fg[:, :inner] + w_fg[:, inner:2 * inner]).T
    wfg_v = w_fg[:, 2 * inner:].T
    ig = x_conv_act @ wig_qk + x_mlstm @ wig_v + params["b_ig"]   # (B, S, NH)
    fg = x_conv_act @ wfg_qk + x_mlstm @ wfg_v + params["b_fg"]   # (B, S, NH)

    # --- cumulative log-forget-gate; fold (ig - cumsum) into one tensor ---
    log_fg = jnp.minimum(fg, 0.0) - jnp.log1p(jnp.exp(-jnp.abs(fg)))
    cs_row = jnp.cumsum(log_fg, axis=1)                           # (B, S, NH)
    ig_minus_cs_col = jnp.transpose(ig - cs_row, (0, 2, 1))       # (B, NH, S)

    gamma_row = (1.0 + params["outnorm_weight"]).reshape(1, inner)

    # --- flash-tiled mLSTM cell + MultiHeadLayerNorm (Pallas) ---
    h = mlstm_cell(q_all, k_all, v_all, ig_minus_cs_col, cs_row, gamma_row,
                   num_heads=NH, head_dim=DH)                     # (B, S, inner)

    # --- skip + output gate + proj_down (Pallas) ---
    out = finalize_proj_down(
        h.reshape(B * S, inner),
        x_conv_act.reshape(B * S, inner),
        z.reshape(B * S, inner),
        params["learnable_skip"].reshape(1, inner),
        params["W_down"].T.astype(MATMUL_DTYPE))
    # dropout p=0.0 -> identity
    return out.reshape(B, S, E)


# ----------------------------------------------------------------------------
# Pure-JAX f32 reference (mirror of the PyTorch math)
# ----------------------------------------------------------------------------
def reference_forward(params, x, cfg):
    B, S, E = x.shape
    inner = cfg["inner_dim"]
    NH = cfg["num_heads"]
    DH = inner // NH
    K = cfg["conv_kernel"]
    NHq = cfg["num_qkv_heads"]
    hd_q = inner // NHq

    x_proj = x @ params["W_up"].T
    x_mlstm, z = x_proj[..., :inner], x_proj[..., inner:]

    x_pad = jnp.pad(x_mlstm, ((0, 0), (K - 1, 0), (0, 0)))
    x_conv = sum(x_pad[:, kk:kk + S, :] * params["W_conv"][:, kk][None, None, :]
                 for kk in range(K))
    x_conv_act = x_conv * jax.nn.sigmoid(x_conv)

    def headwise(xin, w):
        xr = xin.reshape(B, S, NHq, hd_q)
        return jnp.einsum("bshi,hoi->bsho", xr, w).reshape(B, S, inner)

    q = headwise(x_conv_act, params["W_q"]).reshape(B, S, NH, DH).transpose(0, 2, 1, 3)
    k = headwise(x_conv_act, params["W_k"]).reshape(B, S, NH, DH).transpose(0, 2, 1, 3)
    v = headwise(x_mlstm, params["W_v"]).reshape(B, S, NH, DH).transpose(0, 2, 1, 3)

    gate_in = jnp.concatenate([x_conv_act, x_conv_act, x_mlstm], axis=-1)
    ig = (gate_in @ params["W_ig"].T + params["b_ig"]).transpose(0, 2, 1)[..., None]
    fg = (gate_in @ params["W_fg"].T + params["b_fg"]).transpose(0, 2, 1)[..., None]

    log_fg = jnp.minimum(fg, 0.0) - jnp.log1p(jnp.exp(-jnp.abs(fg)))
    cs = jnp.cumsum(log_fg, axis=-2)
    dmat = cs - jnp.swapaxes(cs, -2, -1)
    ltr = jnp.tril(jnp.ones((S, S), dtype=bool))
    log_fg_matrix = jnp.where(ltr[None, None], dmat, -jnp.inf)
    log_D = log_fg_matrix + jnp.swapaxes(ig, -2, -1)
    max_log_D = jnp.max(log_D, axis=-1, keepdims=True)
    D = jnp.exp(log_D - max_log_D)
    qk = jnp.einsum("bhsd,bhtd->bhst", q, k / math.sqrt(DH))
    C = qk * D
    sum_C_abs = jnp.abs(jnp.sum(C, axis=-1, keepdims=True))
    normaliser = jnp.maximum(sum_C_abs, jnp.exp(-max_log_D))
    C_norm = C / (normaliser + EPS)
    h_tilde = jnp.einsum("bhst,bhtd->bhsd", C_norm, v)

    gamma = (1.0 + params["outnorm_weight"]).reshape(1, NH, 1, DH)
    mu = jnp.mean(h_tilde, axis=-1, keepdims=True)
    var = jnp.mean((h_tilde - mu) ** 2, axis=-1, keepdims=True)
    h_norm = (h_tilde - mu) / jnp.sqrt(var + LN_EPS) * gamma
    h_final = h_norm.transpose(0, 2, 1, 3).reshape(B, S, inner)

    h_skip = h_final + params["learnable_skip"] * x_conv_act
    h_gated = h_skip * (z * jax.nn.sigmoid(z))
    return h_gated @ params["W_down"].T


# ----------------------------------------------------------------------------
# Deterministic parameter initialization (shapes from the module's __init__)
# ----------------------------------------------------------------------------
def init_params(key, E, inner, NH, NHq, K):
    hd_q = inner // NHq
    ks = jax.random.split(key, 8)
    std_up = math.sqrt(2.0 / (5.0 * E))
    std_qkv = math.sqrt(2.0 / (5.0 * hd_q))
    std_down = 2.0 / 1.0 / math.sqrt(inner)      # wang_init_, num_blocks=1
    bound_conv = 1.0 / math.sqrt(K)              # torch Conv1d default (depthwise)
    return {
        "W_up": std_up * jax.random.normal(ks[0], (2 * inner, E), jnp.float32),
        "W_conv": jax.random.uniform(ks[1], (inner, K), jnp.float32,
                                     -bound_conv, bound_conv),
        "W_q": std_qkv * jax.random.normal(ks[2], (NHq, hd_q, hd_q), jnp.float32),
        "W_k": std_qkv * jax.random.normal(ks[3], (NHq, hd_q, hd_q), jnp.float32),
        "W_v": std_qkv * jax.random.normal(ks[4], (NHq, hd_q, hd_q), jnp.float32),
        "W_ig": jnp.zeros((NH, 3 * inner), jnp.float32),
        "b_ig": 0.1 * jax.random.normal(ks[5], (NH,), jnp.float32),
        "W_fg": jnp.zeros((NH, 3 * inner), jnp.float32),
        "b_fg": jnp.linspace(3.4, 6.0, NH, dtype=jnp.float32),
        "outnorm_weight": jnp.zeros((inner,), jnp.float32),
        "learnable_skip": jnp.ones((inner,), jnp.float32),
        "W_down": std_down * jax.random.normal(ks[6], (E, inner), jnp.float32),
    }


if __name__ == "__main__":
    # mLSTMLayerConfig(embedding_dim=32, context_length=8, num_heads=4,
    #                  conv1d_kernel_size=4, qkv_proj_blocksize=4, proj_factor=2.0)
    B, S, E = 2, 8, 32
    NH, K_CONV, QKV_BS, PROJ_FACTOR = 4, 4, 4, 2.0
    inner = int(round(E * PROJ_FACTOR / 8.0)) * 8             # 64
    NHq = inner // QKV_BS                                      # 16

    cfg = dict(inner_dim=inner, num_heads=NH, conv_kernel=K_CONV,
               num_qkv_heads=NHq)

    root = jax.random.PRNGKey(0)
    k_param, k_x = jax.random.split(root)
    params = init_params(k_param, E, inner, NH, NHq, K_CONV)
    x = jax.random.normal(k_x, (B, S, E), jnp.float32)

    fwd = jax.jit(functools.partial(mlstm_layer_forward, cfg=cfg))
    out = jax.block_until_ready(fwd(params, x))
    assert out.shape == (B, S, E)

    ref = jax.block_until_ready(reference_forward(params, x, cfg))
    diff = jnp.abs(out - ref)
    tol = 2e-3 + 2e-3 * jnp.abs(ref)
    assert bool(jnp.all(diff <= tol)), (
        f"mismatch vs reference: max_abs={float(jnp.max(diff))}")

    print("KERNEL_OK")
</pallas_src>

<mosaic_0001>
module attributes {stable_mosaic.version = 11 : i64} {
  func.func @_matmul_kernel(%arg0: i32, %arg1: i32, %arg2: i32, %arg3: memref<16x32xf32, #tpu.memory_space<vmem>>, %arg4: memref<32x128xf32, #tpu.memory_space<vmem>>, %arg5: memref<16x128xf32, #tpu.memory_space<vmem>>, %arg6: memref<16x128xf32, #tpu.memory_space<vmem>>) attributes {dimension_semantics = [#tpu.dimension_semantics<parallel>, #tpu.dimension_semantics<parallel>, #tpu.dimension_semantics<arbitrary>], iteration_bounds = array<i64: 1, 1, 1>, scalar_prefetch = 0 : i64, scratch_operands = 1 : i64, tpu.core_type = #tpu.core_type<tc>, window_params = [{transform_indices = @transform_0, window_bounds = array<i64: 16, 32>}, {transform_indices = @transform_1, window_bounds = array<i64: 32, 128>}, {transform_indices = @transform_2, window_bounds = array<i64: 16, 128>}]} {
    %c0_i32 = arith.constant 0 : i32
    %0 = arith.cmpi eq, %arg2, %c0_i32 : i32
    %1 = arith.extui %0 : i1 to i32
    %c0_i32_0 = arith.constant 0 : i32
    %2 = arith.cmpi ne, %1, %c0_i32_0 : i32
    scf.if %2 {
      %cst_10 = arith.constant 0.000000e+00 : f32
      %12 = vector.broadcast %cst_10 : f32 to vector<16x128xf32>
      %c0_11 = arith.constant 0 : index
      %c0_12 = arith.constant 0 : index
      %13 = vector.load %arg6[%c0_11, %c0_12] : memref<16x128xf32, #tpu.memory_space<vmem>>, vector<16x128xf32>
      tpu.vector_store %arg6[%c0_11, %c0_12], %12 {strides = array<i32>} : memref<16x128xf32, #tpu.memory_space<vmem>>, vector<16x128xf32>,
    } else {
    }
    %c0 = arith.constant 0 : index
    %c0_1 = arith.constant 0 : index
    %3 = vector.load %arg6[%c0, %c0_1] : memref<16x128xf32, #tpu.memory_space<vmem>>, vector<16x128xf32>
    %c0_2 = arith.constant 0 : index
    %c0_3 = arith.constant 0 : index
    %4 = vector.load %arg3[%c0_2, %c0_3] : memref<16x32xf32, #tpu.memory_space<vmem>>, vector<16x32xf32>
    %c0_4 = arith.constant 0 : index
    %c0_5 = arith.constant 0 : index
    %5 = vector.load %arg4[%c0_4, %c0_5] : memref<32x128xf32, #tpu.memory_space<vmem>>, vector<32x128xf32>
    %cst = arith.constant dense<0.000000e+00> : vector<16x128xf32>
    %6 = tpu.matmul %4, %5, %cst {dimension_numbers = #tpu.dot_dimension_numbers<[1], [0], [0], [1], [0, 0, 1, 1], [], []>} : vector<16x32xf32>, vector<32x128xf32>, vector<16x128xf32> -> vector<16x128xf32>
    %7 = arith.addf %3, %6 : vector<16x128xf32>
    %c0_6 = arith.constant 0 : index
    %c0_7 = arith.constant 0 : index
    %8 = vector.load %arg6[%c0_6, %c0_7] : memref<16x128xf32, #tpu.memory_space<vmem>>, vector<16x128xf32>
    tpu.vector_store %arg6[%c0_6, %c0_7], %7 {strides = array<i32>} : memref<16x128xf32, #tpu.memory_space<vmem>>, vector<16x128xf32>,
    %c0_i32_8 = arith.constant 0 : i32
    %9 = arith.cmpi eq, %arg2, %c0_i32_8 : i32
    %10 = arith.extui %9 : i1 to i32
    %c0_i32_9 = arith.constant 0 : i32
    %11 = arith.cmpi ne, %10, %c0_i32_9 : i32
    scf.if %11 {
      %c0_10 = arith.constant 0 : index
      %c0_11 = arith.constant 0 : index
      %12 = vector.load %arg6[%c0_10, %c0_11] : memref<16x128xf32, #tpu.memory_space<vmem>>, vector<16x128xf32>
      %c0_12 = arith.constant 0 : index
      %c0_13 = arith.constant 0 : index
      %13 = vector.load %arg5[%c0_12, %c0_13] : memref<16x128xf32, #tpu.memory_space<vmem>>, vector<16x128xf32>
      tpu.vector_store %arg5[%c0_12, %c0_13], %12 {strides = array<i32>} : memref<16x128xf32, #tpu.memory_space<vmem>>, vector<16x128xf32>,
    } else {
    }
    return
  }
  func.func @transform_0(%arg0: i32, %arg1: i32, %arg2: i32) -> (i32, i32) {
    %c0_i32 = arith.constant 0 : i32
    return %arg0, %arg2 : i32, i32
  }
  func.func @transform_1(%arg0: i32, %arg1: i32, %arg2: i32) -> (i32, i32) {
    %c0_i32 = arith.constant 0 : i32
    return %arg2, %arg1 : i32, i32
  }
  func.func @transform_2(%arg0: i32, %arg1: i32, %arg2: i32) -> (i32, i32) {
    %c0_i32 = arith.constant 0 : i32
    return %arg0, %arg1 : i32, i32
  }
}

module attributes {stable_mosaic.version = 11 : i64} {
  func.func @_matmul_kernel(%arg0: i32, %arg1: i32, %arg2: i32, %arg3: memref<16x64xf32, #tpu.memory_space<vmem>>, %arg4: memref<64x128xf32, #tpu.memory_space<vmem>>, %arg5: memref<16x128xf32, #tpu.memory_space<vmem>>, %arg6: memref<16x128xf32, #tpu.memory_space<vmem>>) attributes {dimension_semantics = [#tpu.dimension_semantics<parallel>, #tpu.dimension_semantics<parallel>, #tpu.dimension_semantics<arbitrary>], iteration_bounds = array<i64: 1, 1, 1>, scalar_prefetch = 0 : i64, scratch_operands = 1 : i64, tpu.core_type = #tpu.core_type<tc>, window_params = [{transform_indices = @transform_0, window_bounds = array<i64: 16, 64>}, {transform_indices = @transform_1, window_bounds = array<i64: 64, 128>}, {transform_indices = @transform_2, window_bounds = array<i64: 16, 128>}]} {
    %c0_i32 = arith.constant 0 : i32
    %0 = arith.cmpi eq, %arg2, %c0_i32 : i32
    %1 = arith.extui %0 : i1 to i32
    %c0_i32_0 = arith.constant 0 : i32
    %2 = arith.cmpi ne, %1, %c0_i32_0 : i32
    scf.if %2 {
      %cst_10 = arith.constant 0.000000e+00 : f32
      %12 = vector.broadcast %cst_10 : f32 to vector<16x128xf32>
      %c0_11 = arith.constant 0 : index
      %c0_12 = arith.constant 0 : index
      %13 = vector.load %arg6[%c0_11, %c0_12] : memref<16x128xf32, #tpu.memory_space<vmem>>, vector<16x128xf32>
      tpu.vector_store %arg6[%c0_11, %c0_12], %12 {strides = array<i32>} : memref<16x128xf32, #tpu.memory_space<vmem>>, vector<16x128xf32>,
    } else {
    }
    %c0 = arith.constant 0 : index
    %c0_1 = arith.constant 0 : index
    %3 = vector.load %arg6[%c0, %c0_1] : memref<16x128xf32, #tpu.memory_space<vmem>>, vector<16x128xf32>
    %c0_2 = arith.constant 0 : index
    %c0_3 = arith.constant 0 : index
    %4 = vector.load %arg3[%c0_2, %c0_3] : memref<16x64xf32, #tpu.memory_space<vmem>>, vector<16x64xf32>
    %c0_4 = arith.constant 0 : index
    %c0_5 = arith.constant 0 : index
    %5 = vector.load %arg4[%c0_4, %c0_5] : memref<64x128xf32, #tpu.memory_space<vmem>>, vector<64x128xf32>
    %cst = arith.constant dense<0.000000e+00> : vector<16x128xf32>
    %6 = tpu.matmul %4, %5, %cst {dimension_numbers = #tpu.dot_dimension_numbers<[1], [0], [0], [1], [0, 0, 1, 1], [], []>} : vector<16x64xf32>, vector<64x128xf32>, vector<16x128xf32> -> vector<16x128xf32>
    %7 = arith.addf %3, %6 : vector<16x128xf32>
    %c0_6 = arith.constant 0 : index
    %c0_7 = arith.constant 0 : index
    %8 = vector.load %arg6[%c0_6, %c0_7] : memref<16x128xf32, #tpu.memory_space<vmem>>, vector<16x128xf32>
    tpu.vector_store %arg6[%c0_6, %c0_7], %7 {strides = array<i32>} : memref<16x128xf32, #tpu.memory_space<vmem>>, vector<16x128xf32>,
    %c0_i32_8 = arith.constant 0 : i32
    %9 = arith.cmpi eq, %arg2, %c0_i32_8 : i32
    %10 = arith.extui %9 : i1 to i32
    %c0_i32_9 = arith.constant 0 : i32
    %11 = arith.cmpi ne, %10, %c0_i32_9 : i32
    scf.if %11 {
      %c0_10 = arith.constant 0 : index
      %c0_11 = arith.constant 0 : index
      %12 = vector.load %arg6[%c0_10, %c0_11] : memref<16x128xf32, #tpu.memory_space<vmem>>, vector<16x128xf32>
      %c0_12 = arith.constant 0 : index
      %c0_13 = arith.constant 0 : index
      %13 = vector.load %arg5[%c0_12, %c0_13] : memref<16x128xf32, #tpu.memory_space<vmem>>, vector<16x128xf32>
      tpu.vector_store %arg5[%c0_12, %c0_13], %12 {strides = array<i32>} : memref<16x128xf32, #tpu.memory_space<vmem>>, vector<16x128xf32>,
    } else {
    }
    return
  }
  func.func @transform_0(%arg0: i32, %arg1: i32, %arg2: i32) -> (i32, i32) {
    %c0_i32 = arith.constant 0 : i32
    return %arg0, %arg2 : i32, i32
  }
  func.func @transform_1(%arg0: i32, %arg1: i32, %arg2: i32) -> (i32, i32) {
    %c0_i32 = arith.constant 0 : i32
    return %arg2, %arg1 : i32, i32
  }
  func.func @transform_2(%arg0: i32, %arg1: i32, %arg2: i32) -> (i32, i32) {
    %c0_i32 = arith.constant 0 : i32
    return %arg0, %arg1 : i32, i32
  }
}

module attributes {stable_mosaic.version = 11 : i64} {
  func.func @_matmul_kernel(%arg0: i32, %arg1: i32, %arg2: i32, %arg3: memref<16x64xf32, #tpu.memory_space<vmem>>, %arg4: memref<64x64xf32, #tpu.memory_space<vmem>>, %arg5: memref<16x64xf32, #tpu.memory_space<vmem>>, %arg6: memref<16x64xf32, #tpu.memory_space<vmem>>) attributes {dimension_semantics = [#tpu.dimension_semantics<parallel>, #tpu.dimension_semantics<parallel>, #tpu.dimension_semantics<arbitrary>], iteration_bounds = array<i64: 1, 1, 1>, scalar_prefetch = 0 : i64, scratch_operands = 1 : i64, tpu.core_type = #tpu.core_type<tc>, window_params = [{transform_indices = @transform_0, window_bounds = array<i64: 16, 64>}, {transform_indices = @transform_1, window_bounds = array<i64: 64, 64>}, {transform_indices = @transform_2, window_bounds = array<i64: 16, 64>}]} {
    %c0_i32 = arith.constant 0 : i32
    %0 = arith.cmpi eq, %arg2, %c0_i32 : i32
    %1 = arith.extui %0 : i1 to i32
    %c0_i32_0 = arith.constant 0 : i32
    %2 = arith.cmpi ne, %1, %c0_i32_0 : i32
    scf.if %2 {
      %cst_10 = arith.constant 0.000000e+00 : f32
      %12 = vector.broadcast %cst_10 : f32 to vector<16x64xf32>
      %c0_11 = arith.constant 0 : index
      %c0_12 = arith.constant 0 : index
      %13 = vector.load %arg6[%c0_11, %c0_12] : memref<16x64xf32, #tpu.memory_space<vmem>>, vector<16x64xf32>
      tpu.vector_store %arg6[%c0_11, %c0_12], %12 {strides = array<i32>} : memref<16x64xf32, #tpu.memory_space<vmem>>, vector<16x64xf32>,
    } else {
    }
    %c0 = arith.constant 0 : index
    %c0_1 = arith.constant 0 : index
    %3 = vector.load %arg6[%c0, %c0_1] : memref<16x64xf32, #tpu.memory_space<vmem>>, vector<16x64xf32>
    %c0_2 = arith.constant 0 : index
    %c0_3 = arith.constant 0 : index
    %4 = vector.load %arg3[%c0_2, %c0_3] : memref<16x64xf32, #tpu.memory_space<vmem>>, vector<16x64xf32>
    %c0_4 = arith.constant 0 : index
    %c0_5 = arith.constant 0 : index
    %5 = vector.load %arg4[%c0_4, %c0_5] : memref<64x64xf32, #tpu.memory_space<vmem>>, vector<64x64xf32>
    %cst = arith.constant dense<0.000000e+00> : vector<16x64xf32>
    %6 = tpu.matmul %4, %5, %cst {dimension_numbers = #tpu.dot_dimension_numbers<[1], [0], [0], [1], [0, 0, 1, 1], [], []>} : vector<16x64xf32>, vector<64x64xf32>, vector<16x64xf32> -> vector<16x64xf32>
    %7 = arith.addf %3, %6 : vector<16x64xf32>
    %c0_6 = arith.constant 0 : index
    %c0_7 = arith.constant 0 : index
    %8 = vector.load %arg6[%c0_6, %c0_7] : memref<16x64xf32, #tpu.memory_space<vmem>>, vector<16x64xf32>
    tpu.vector_store %arg6[%c0_6, %c0_7], %7 {strides = array<i32>} : memref<16x64xf32, #tpu.memory_space<vmem>>, vector<16x64xf32>,
    %c0_i32_8 = arith.constant 0 : i32
    %9 = arith.cmpi eq, %arg2, %c0_i32_8 : i32
    %10 = arith.extui %9 : i1 to i32
    %c0_i32_9 = arith.constant 0 : i32
    %11 = arith.cmpi ne, %10, %c0_i32_9 : i32
    scf.if %11 {
      %c0_10 = arith.constant 0 : index
      %c0_11 = arith.constant 0 : index
      %12 = vector.load %arg6[%c0_10, %c0_11] : memref<16x64xf32, #tpu.memory_space<vmem>>, vector<16x64xf32>
      %c0_12 = arith.constant 0 : index
      %c0_13 = arith.constant 0 : index
      %13 = vector.load %arg5[%c0_12, %c0_13] : memref<16x64xf32, #tpu.memory_space<vmem>>, vector<16x64xf32>
      tpu.vector_store %arg5[%c0_12, %c0_13], %12 {strides = array<i32>} : memref<16x64xf32, #tpu.memory_space<vmem>>, vector<16x64xf32>,
    } else {
    }
    return
  }
  func.func @transform_0(%arg0: i32, %arg1: i32, %arg2: i32) -> (i32, i32) {
    %c0_i32 = arith.constant 0 : i32
    return %arg0, %arg2 : i32, i32
  }
  func.func @transform_1(%arg0: i32, %arg1: i32, %arg2: i32) -> (i32, i32) {
    %c0_i32 = arith.constant 0 : i32
    return %arg2, %arg1 : i32, i32
  }
  func.func @transform_2(%arg0: i32, %arg1: i32, %arg2: i32) -> (i32, i32) {
    %c0_i32 = arith.constant 0 : i32
    return %arg0, %arg1 : i32, i32
  }
}

module attributes {stable_mosaic.version = 11 : i64} {
  func.func @_mlstm_cell_kernel(%arg0: i32, %arg1: i32, %arg2: memref<1xi32, #tpu.memory_space<smem>>, %arg3: memref<1xi32, #tpu.memory_space<smem>>, %arg4: memref<1x8x64xf32, #tpu.memory_space<vmem>>, %arg5: memref<1x8x64xf32, #tpu.memory_space<vmem>>, %arg6: memref<1x8x64xf32, #tpu.memory_space<vmem>>, %arg7: memref<1x4x8xf32, #tpu.memory_space<vmem>>, %arg8: memref<1x8x4xf32, #tpu.memory_space<vmem>>, %arg9: memref<1x64xf32, #tpu.memory_space<vmem>>, %arg10: memref<1x8x64xf32, #tpu.memory_space<vmem>>, %arg11: memref<8x4xf32, #tpu.memory_space<vmem>>, %arg12: memref<8x4xf32, #tpu.memory_space<vmem>>, %arg13: memref<8x64xf32, #tpu.memory_space<vmem>>) attributes {dimension_semantics = [#tpu.dimension_semantics<parallel>, #tpu.dimension_semantics<arbitrary>], iteration_bounds = array<i64: 2, 1>, scalar_prefetch = 2 : i64, scratch_operands = 3 : i64, tpu.core_type = #tpu.core_type<tc>, window_params = [{transform_indices = @transform_0, window_bounds = array<i64: 1, 8, 64>}, {transform_indices = @transform_1, window_bounds = array<i64: 1, 8, 64>}, {transform_indices = @transform_2, window_bounds = array<i64: 1, 8, 64>}, {transform_indices = @transform_3, window_bounds = array<i64: 1, 4, 8>}, {transform_indices = @transform_4, window_bounds = array<i64: 1, 8, 4>}, {pipeline_mode = #tpu.pipeline_mode<synchronous>, transform_indices = @transform_5, window_bounds = array<i64: 1, 64>}, {transform_indices = @transform_6, window_bounds = array<i64: 1, 8, 64>}]} {
    %0 = arith.index_cast %arg1 : i32 to index
    %1 = memref.load %arg2[%0] : memref<1xi32, #tpu.memory_space<smem>>
    %2 = arith.index_cast %arg1 : i32 to index
    %3 = memref.load %arg3[%2] : memref<1xi32, #tpu.memory_space<smem>>
    %c0_i32 = arith.constant 0 : i32
    %4 = arith.cmpi eq, %3, %c0_i32 : i32
    %5 = arith.extui %4 : i1 to i32
    %c0_i32_0 = arith.constant 0 : i32
    %6 = arith.cmpi ne, %5, %c0_i32_0 : i32
    scf.if %6 {
      %cst_82 = arith.constant 0xFF800000 : f32
      %173 = vector.broadcast %cst_82 : f32 to vector<8x4xf32>
      %c0_83 = arith.constant 0 : index
      %c0_84 = arith.constant 0 : index
      %174 = vector.load %arg11[%c0_83, %c0_84] : memref<8x4xf32, #tpu.memory_space<vmem>>, vector<8x4xf32>
      tpu.vector_store %arg11[%c0_83, %c0_84], %173 {strides = array<i32>} : memref<8x4xf32, #tpu.memory_space<vmem>>, vector<8x4xf32>,
      %cst_85 = arith.constant 0.000000e+00 : f32
      %175 = vector.broadcast %cst_85 : f32 to vector<8x4xf32>
      %c0_86 = arith.constant 0 : index
      %c0_87 = arith.constant 0 : index
      %176 = vector.load %arg12[%c0_86, %c0_87] : memref<8x4xf32, #tpu.memory_space<vmem>>, vector<8x4xf32>
      tpu.vector_store %arg12[%c0_86, %c0_87], %175 {strides = array<i32>} : memref<8x4xf32, #tpu.memory_space<vmem>>, vector<8x4xf32>,
      %cst_88 = arith.constant 0.000000e+00 : f32
      %177 = vector.broadcast %cst_88 : f32 to vector<8x64xf32>
      %c0_89 = arith.constant 0 : index
      %c0_90 = arith.constant 0 : index
      %178 = vector.load %arg13[%c0_89, %c0_90] : memref<8x64xf32, #tpu.memory_space<vmem>>, vector<8x64xf32>
      tpu.vector_store %arg13[%c0_89, %c0_90], %177 {strides = array<i32>} : memref<8x64xf32, #tpu.memory_space<vmem>>, vector<8x64xf32>,
    } else {
    }
    %c0 = arith.constant 0 : index
    %c0_1 = arith.constant 0 : index
    %c0_2 = arith.constant 0 : index
    %7 = vector.load %arg4[%c0, %c0_1, %c0_2] : memref<1x8x64xf32, #tpu.memory_space<vmem>>, vector<1x8x64xf32>
    %8 = vector.shape_cast %7 : vector<1x8x64xf32> to vector<8x64xf32>
    %c0_3 = arith.constant 0 : index
    %c0_4 = arith.constant 0 : index
    %c0_5 = arith.constant 0 : index
    %9 = vector.load %arg5[%c0_3, %c0_4, %c0_5] : memref<1x8x64xf32, #tpu.memory_space<vmem>>, vector<1x8x64xf32>
    %10 = vector.shape_cast %9 : vector<1x8x64xf32> to vector<8x64xf32>
    %c0_6 = arith.constant 0 : index
    %c0_7 = arith.constant 0 : index
    %c0_8 = arith.constant 0 : index
    %11 = vector.load %arg6[%c0_6, %c0_7, %c0_8] : memref<1x8x64xf32, #tpu.memory_space<vmem>>, vector<1x8x64xf32>
    %12 = vector.shape_cast %11 : vector<1x8x64xf32> to vector<8x64xf32>
    %c0_9 = arith.constant 0 : index
    %c0_10 = arith.constant 0 : index
    %c0_11 = arith.constant 0 : index
    %13 = vector.load %arg7[%c0_9, %c0_10, %c0_11] : memref<1x4x8xf32, #tpu.memory_space<vmem>>, vector<1x4x8xf32>
    %14 = vector.shape_cast %13 : vector<1x4x8xf32> to vector<4x8xf32>
    %c0_12 = arith.constant 0 : index
    %c0_13 = arith.constant 0 : index
    %c0_14 = arith.constant 0 : index
    %15 = vector.load %arg8[%c0_12, %c0_13, %c0_14] : memref<1x8x4xf32, #tpu.memory_space<vmem>>, vector<1x8x4xf32>
    %16 = vector.shape_cast %15 : vector<1x8x4xf32> to vector<8x4xf32>
    %c8_i32 = arith.constant 8 : i32
    %17 = arith.muli %1, %c8_i32 : i32
    %18 = tpu.iota {dimensions = array<i32: 0>} : vector<8x8xi32>
    %19 = vector.broadcast %17 : i32 to vector<8x8xi32>
    %20 = arith.addi %19, %18 : vector<8x8xi32>
    %c8_i32_15 = arith.constant 8 : i32
    %21 = arith.muli %3, %c8_i32_15 : i32
    %22 = tpu.iota {dimensions = array<i32: 1>} : vector<8x8xi32>
    %23 = vector.broadcast %21 : i32 to vector<8x8xi32>
    %24 = arith.addi %23, %22 : vector<8x8xi32>
    %25 = arith.cmpi sge, %20, %24 : vector<8x8xi32>
    %26 = vector.extract_strided_slice %16 {offsets = [0, 0], sizes = [8, 1], strides = [1, 1]} : vector<8x4xf32> to vector<8x1xf32>
    %27 = vector.extract_strided_slice %14 {offsets = [0, 0], sizes = [1, 8], strides = [1, 1]} : vector<4x8xf32> to vector<1x8xf32>
    %28 = vector.broadcast %26 : vector<8x1xf32> to vector<8x8xf32>
    %29 = vector.broadcast %27 : vector<1x8xf32> to vector<8x8xf32>
    %30 = arith.addf %28, %29 : vector<8x8xf32>
    %cst = arith.constant 0xFF800000 : f32
    %31 = vector.broadcast %cst : f32 to vector<8x8xf32>
    %32 = arith.select %25, %30, %31 : vector<8x8xi1>, vector<8x8xf32>
    %c0_16 = arith.constant 0 : index
    %c0_17 = arith.constant 0 : index
    %33 = vector.load %arg11[%c0_16, %c0_17] : memref<8x4xf32, #tpu.memory_space<vmem>>, vector<8x1xf32>
    %cst_18 = arith.constant dense<0xFF800000> : vector<8xf32>
    %34 = vector.multi_reduction <maximumf>, %32, %cst_18 [1] : vector<8x8xf32> to vector<8xf32>
    %35 = vector.shape_cast %34 : vector<8xf32> to vector<8x1xf32>
    %36 = arith.maximumf %33, %35 : vector<8x1xf32>
    %37 = arith.subf %33, %36 : vector<8x1xf32>
    %38 = math.exp %37 : vector<8x1xf32>
    %39 = vector.extract_strided_slice %8 {offsets = [0, 0], sizes = [8, 16], strides = [1, 1]} : vector<8x64xf32> to vector<8x16xf32>
    %40 = vector.extract_strided_slice %10 {offsets = [0, 0], sizes = [8, 16], strides = [1, 1]} : vector<8x64xf32> to vector<8x16xf32>
    %cst_19 = arith.constant dense<0.000000e+00> : vector<8x8xf32>
    %41 = tpu.matmul %39, %40, %cst_19 {dimension_numbers = #tpu.dot_dimension_numbers<[1], [1], [0], [0], [0, 0, 1, 0], [], []>} : vector<8x16xf32>, vector<8x16xf32>, vector<8x8xf32> -> vector<8x8xf32>
    %cst_20 = arith.constant 2.500000e-01 : f32
    %42 = vector.broadcast %cst_20 : f32 to vector<8x8xf32>
    %43 = arith.mulf %41, %42 : vector<8x8xf32>
    %44 = vector.broadcast %36 : vector<8x1xf32> to vector<8x8xf32>
    %45 = arith.subf %32, %44 : vector<8x8xf32>
    %46 = math.exp %45 : vector<8x8xf32>
    %47 = arith.mulf %43, %46 : vector<8x8xf32>
    %c0_21 = arith.constant 0 : index
    %c0_22 = arith.constant 0 : index
    %48 = vector.load %arg12[%c0_21, %c0_22] : memref<8x4xf32, #tpu.memory_space<vmem>>, vector<8x1xf32>
    %49 = arith.mulf %38, %48 : vector<8x1xf32>
    %cst_23 = arith.constant dense<0.000000e+00> : vector<8xf32>
    %50 = vector.multi_reduction <add>, %47, %cst_23 [1] : vector<8x8xf32> to vector<8xf32>
    %51 = vector.shape_cast %50 : vector<8xf32> to vector<8x1xf32>
    %52 = arith.addf %49, %51 : vector<8x1xf32>
    %c0_24 = arith.constant 0 : index
    %c0_25 = arith.constant 0 : index
    %53 = vector.load %arg12[%c0_24, %c0_25] : memref<8x4xf32, #tpu.memory_space<vmem>>, vector<8x1xf32>
    tpu.vector_store %arg12[%c0_24, %c0_25], %52 {strides = array<i32>} : memref<8x4xf32, #tpu.memory_space<vmem>>, vector<8x1xf32>,
    %c0_26 = arith.constant 0 : index
    %c0_27 = arith.constant 0 : index
    %54 = vector.load %arg13[%c0_26, %c0_27] : memref<8x64xf32, #tpu.memory_space<vmem>>, vector<8x16xf32>
    %55 = vector.broadcast %38 : vector<8x1xf32> to vector<8x16xf32>
    %56 = arith.mulf %55, %54 : vector<8x16xf32>
    %57 = vector.extract_strided_slice %12 {offsets = [0, 0], sizes = [8, 16], strides = [1, 1]} : vector<8x64xf32> to vector<8x16xf32>
    %cst_28 = arith.constant dense<0.000000e+00> : vector<8x16xf32>
    %58 = tpu.matmul %47, %57, %cst_28 {dimension_numbers = #tpu.dot_dimension_numbers<[1], [0], [0], [1], [0, 0, 1, 1], [], []>} : vector<8x8xf32>, vector<8x16xf32>, vector<8x16xf32> -> vector<8x16xf32>
    %59 = arith.addf %56, %58 : vector<8x16xf32>
    %c0_29 = arith.constant 0 : index
    %c0_30 = arith.constant 0 : index
    %60 = vector.load %arg13[%c0_29, %c0_30] : memref<8x64xf32, #tpu.memory_space<vmem>>, vector<8x16xf32>
    tpu.vector_store %arg13[%c0_29, %c0_30], %59 {strides = array<i32>} : memref<8x64xf32, #tpu.memory_space<vmem>>, vector<8x16xf32>,
    %c0_31 = arith.constant 0 : index
    %c0_32 = arith.constant 0 : index
    %61 = vector.load %arg11[%c0_31, %c0_32] : memref<8x4xf32, #tpu.memory_space<vmem>>, vector<8x1xf32>
    tpu.vector_store %arg11[%c0_31, %c0_32], %36 {strides = array<i32>} : memref<8x4xf32, #tpu.memory_space<vmem>>, vector<8x1xf32>,
    %62 = vector.extract_strided_slice %16 {offsets = [0, 1], sizes = [8, 1], strides = [1, 1]} : vector<8x4xf32> to vector<8x1xf32>
    %63 = vector.extract_strided_slice %14 {offsets = [1, 0], sizes = [1, 8], strides = [1, 1]} : vector<4x8xf32> to vector<1x8xf32>
    %64 = vector.broadcast %62 : vector<8x1xf32> to vector<8x8xf32>
    %65 = vector.broadcast %63 : vector<1x8xf32> to vector<8x8xf32>
    %66 = arith.addf %64, %65 : vector<8x8xf32>
    %cst_33 = arith.constant 0xFF800000 : f32
    %67 = vector.broadcast %cst_33 : f32 to vector<8x8xf32>
    %68 = arith.select %25, %66, %67 : vector<8x8xi1>, vector<8x8xf32>
    %c0_34 = arith.constant 0 : index
    %c1 = arith.constant 1 : index
    %69 = vector.load %arg11[%c0_34, %c1] : memref<8x4xf32, #tpu.memory_space<vmem>>, vector<8x1xf32>
    %cst_35 = arith.constant dense<0xFF800000> : vector<8xf32>
    %70 = vector.multi_reduction <maximumf>, %68, %cst_35 [1] : vector<8x8xf32> to vector<8xf32>
    %71 = vector.shape_cast %70 : vector<8xf32> to vector<8x1xf32>
    %72 = arith.maximumf %69, %71 : vector<8x1xf32>
    %73 = arith.subf %69, %72 : vector<8x1xf32>
    %74 = math.exp %73 : vector<8x1xf32>
    %75 = vector.extract_strided_slice %8 {offsets = [0, 16], sizes = [8, 16], strides = [1, 1]} : vector<8x64xf32> to vector<8x16xf32>
    %76 = vector.extract_strided_slice %10 {offsets = [0, 16], sizes = [8, 16], strides = [1, 1]} : vector<8x64xf32> to vector<8x16xf32>
    %cst_36 = arith.constant dense<0.000000e+00> : vector<8x8xf32>
    %77 = tpu.matmul %75, %76, %cst_36 {dimension_numbers = #tpu.dot_dimension_numbers<[1], [1], [0], [0], [0, 0, 1, 0], [], []>} : vector<8x16xf32>, vector<8x16xf32>, vector<8x8xf32> -> vector<8x8xf32>
    %cst_37 = arith.constant 2.500000e-01 : f32
    %78 = vector.broadcast %cst_37 : f32 to vector<8x8xf32>
    %79 = arith.mulf %77, %78 : vector<8x8xf32>
    %80 = vector.broadcast %72 : vector<8x1xf32> to vector<8x8xf32>
    %81 = arith.subf %68, %80 : vector<8x8xf32>
    %82 = math.exp %81 : vector<8x8xf32>
    %83 = arith.mulf %79, %82 : vector<8x8xf32>
    %c0_38 = arith.constant 0 : index
    %c1_39 = arith.constant 1 : index
    %84 = vector.load %arg12[%c0_38, %c1_39] : memref<8x4xf32, #tpu.memory_space<vmem>>, vector<8x1xf32>
    %85 = arith.mulf %74, %84 : vector<8x1xf32>
    %cst_40 = arith.constant dense<0.000000e+00> : vector<8xf32>
    %86 = vector.multi_reduction <add>, %83, %cst_40 [1] : vector<8x8xf32> to vector<8xf32>
    %87 = vector.shape_cast %86 : vector<8xf32> to vector<8x1xf32>
    %88 = arith.addf %85, %87 : vector<8x1xf32>
    %c0_41 = arith.constant 0 : index
    %c1_42 = arith.constant 1 : index
    %89 = vector.load %arg12[%c0_41, %c1_42] : memref<8x4xf32, #tpu.memory_space<vmem>>, vector<8x1xf32>
    tpu.vector_store %arg12[%c0_41, %c1_42], %88 {strides = array<i32>} : memref<8x4xf32, #tpu.memory_space<vmem>>, vector<8x1xf32>,
    %c0_43 = arith.constant 0 : index
    %c16 = arith.constant 16 : index
    %90 = vector.load %arg13[%c0_43, %c16] : memref<8x64xf32, #tpu.memory_space<vmem>>, vector<8x16xf32>
    %91 = vector.broadcast %74 : vector<8x1xf32> to vector<8x16xf32>
    %92 = arith.mulf %91, %90 : vector<8x16xf32>
    %93 = vector.extract_strided_slice %12 {offsets = [0, 16], sizes = [8, 16], strides = [1, 1]} : vector<8x64xf32> to vector<8x16xf32>
    %cst_44 = arith.constant dense<0.000000e+00> : vector<8x16xf32>
    %94 = tpu.matmul %83, %93, %cst_44 {dimension_numbers = #tpu.dot_dimension_numbers<[1], [0], [0], [1], [0, 0, 1, 1], [], []>} : vector<8x8xf32>, vector<8x16xf32>, vector<8x16xf32> -> vector<8x16xf32>
    %95 = arith.addf %92, %94 : vector<8x16xf32>
    %c0_45 = arith.constant 0 : index
    %c16_46 = arith.constant 16 : index
    %96 = vector.load %arg13[%c0_45, %c16_46] : memref<8x64xf32, #tpu.memory_space<vmem>>, vector<8x16xf32>
    tpu.vector_store %arg13[%c0_45, %c16_46], %95 {strides = array<i32>} : memref<8x64xf32, #tpu.memory_space<vmem>>, vector<8x16xf32>,
    %c0_47 = arith.constant 0 : index
    %c1_48 = arith.constant 1 : index
    %97 = vector.load %arg11[%c0_47, %c1_48] : memref<8x4xf32, #tpu.memory_space<vmem>>, vector<8x1xf32>
    tpu.vector_store %arg11[%c0_47, %c1_48], %72 {strides = array<i32>} : memref<8x4xf32, #tpu.memory_space<vmem>>, vector<8x1xf32>,
    %98 = vector.extract_strided_slice %16 {offsets = [0, 2], sizes = [8, 1], strides = [1, 1]} : vector<8x4xf32> to vector<8x1xf32>
    %99 = vector.extract_strided_slice %14 {offsets = [2, 0], sizes = [1, 8], strides = [1, 1]} : vector<4x8xf32> to vector<1x8xf32>
    %100 = vector.broadcast %98 : vector<8x1xf32> to vector<8x8xf32>
    %101 = vector.broadcast %99 : vector<1x8xf32> to vector<8x8xf32>
    %102 = arith.addf %100, %101 : vector<8x8xf32>
    %cst_49 = arith.constant 0xFF800000 : f32
    %103 = vector.broadcast %cst_49 : f32 to vector<8x8xf32>
    %104 = arith.select %25, %102, %103 : vector<8x8xi1>, vector<8x8xf32>
    %c0_50 = arith.constant 0 : index
    %c2 = arith.constant 2 : index
    %105 = vector.load %arg11[%c0_50, %c2] : memref<8x4xf32, #tpu.memory_space<vmem>>, vector<8x1xf32>
    %cst_51 = arith.constant dense<0xFF800000> : vector<8xf32>
    %106 = vector.multi_reduction <maximumf>, %104, %cst_51 [1] : vector<8x8xf32> to vector<8xf32>
    %107 = vector.shape_cast %106 : vector<8xf32> to vector<8x1xf32>
    %108 = arith.maximumf %105, %107 : vector<8x1xf32>
    %109 = arith.subf %105, %108 : vector<8x1xf32>
    %110 = math.exp %109 : vector<8x1xf32>
    %111 = vector.extract_strided_slice %8 {offsets = [0, 32], sizes = [8, 16], strides = [1, 1]} : vector<8x64xf32> to vector<8x16xf32>
    %112 = vector.extract_strided_slice %10 {offsets = [0, 32], sizes = [8, 16], strides = [1, 1]} : vector<8x64xf32> to vector<8x16xf32>
    %cst_52 = arith.constant dense<0.000000e+00> : vector<8x8xf32>
    %113 = tpu.matmul %111, %112, %cst_52 {dimension_numbers = #tpu.dot_dimension_numbers<[1], [1], [0], [0], [0, 0, 1, 0], [], []>} : vector<8x16xf32>, vector<8x16xf32>, vector<8x8xf32> -> vector<8x8xf32>
    %cst_53 = arith.constant 2.500000e-01 : f32
    %114 = vector.broadcast %cst_53 : f32 to vector<8x8xf32>
    %115 = arith.mulf %113, %114 : vector<8x8xf32>
    %116 = vector.broadcast %108 : vector<8x1xf32> to vector<8x8xf32>
    %117 = arith.subf %104, %116 : vector<8x8xf32>
    %118 = math.exp %117 : vector<8x8xf32>
    %119 = arith.mulf %115, %118 : vector<8x8xf32>
    %c0_54 = arith.constant 0 : index
    %c2_55 = arith.constant 2 : index
    %120 = vector.load %arg12[%c0_54, %c2_55] : memref<8x4xf32, #tpu.memory_space<vmem>>, vector<8x1xf32>
    %121 = arith.mulf %110, %120 : vector<8x1xf32>
    %cst_56 = arith.constant dense<0.000000e+00> : vector<8xf32>
    %122 = vector.multi_reduction <add>, %119, %cst_56 [1] : vector<8x8xf32> to vector<8xf32>
    %123 = vector.shape_cast %122 : vector<8xf32> to vector<8x1xf32>
    %124 = arith.addf %121, %123 : vector<8x1xf32>
    %c0_57 = arith.constant 0 : index
    %c2_58 = arith.constant 2 : index
    %125 = vector.load %arg12[%c0_57, %c2_58] : memref<8x4xf32, #tpu.memory_space<vmem>>, vector<8x1xf32>
    tpu.vector_store %arg12[%c0_57, %c2_58], %124 {strides = array<i32>} : memref<8x4xf32, #tpu.memory_space<vmem>>, vector<8x1xf32>,
    %c0_59 = arith.constant 0 : index
    %c32 = arith.constant 32 : index
    %126 = vector.load %arg13[%c0_59, %c32] : memref<8x64xf32, #tpu.memory_space<vmem>>, vector<8x16xf32>
    %127 = vector.broadcast %110 : vector<8x1xf32> to vector<8x16xf32>
    %128 = arith.mulf %127, %126 : vector<8x16xf32>
    %129 = vector.extract_strided_slice %12 {offsets = [0, 32], sizes = [8, 16], strides = [1, 1]} : vector<8x64xf32> to vector<8x16xf32>
    %cst_60 = arith.constant dense<0.000000e+00> : vector<8x16xf32>
    %130 = tpu.matmul %119, %129, %cst_60 {dimension_numbers = #tpu.dot_dimension_numbers<[1], [0], [0], [1], [0, 0, 1, 1], [], []>} : vector<8x8xf32>, vector<8x16xf32>, vector<8x16xf32> -> vector<8x16xf32>
    %131 = arith.addf %128, %130 : vector<8x16xf32>
    %c0_61 = arith.constant 0 : index
    %c32_62 = arith.constant 32 : index
    %132 = vector.load %arg13[%c0_61, %c32_62] : memref<8x64xf32, #tpu.memory_space<vmem>>, vector<8x16xf32>
    tpu.vector_store %arg13[%c0_61, %c32_62], %131 {strides = array<i32>} : memref<8x64xf32, #tpu.memory_space<vmem>>, vector<8x16xf32>,
    %c0_63 = arith.constant 0 : index
    %c2_64 = arith.constant 2 : index
    %133 = vector.load %arg11[%c0_63, %c2_64] : memref<8x4xf32, #tpu.memory_space<vmem>>, vector<8x1xf32>
    tpu.vector_store %arg11[%c0_63, %c2_64], %108 {strides = array<i32>} : memref<8x4xf32, #tpu.memory_space<vmem>>, vector<8x1xf32>,
    %134 = vector.extract_strided_slice %16 {offsets = [0, 3], sizes = [8, 1], strides = [1, 1]} : vector<8x4xf32> to vector<8x1xf32>
    %135 = vector.extract_strided_slice %14 {offsets = [3, 0], sizes = [1, 8], strides = [1, 1]} : vector<4x8xf32> to vector<1x8xf32>
    %136 = vector.broadcast %134 : vector<8x1xf32> to vector<8x8xf32>
    %137 = vector.broadcast %135 : vector<1x8xf32> to vector<8x8xf32>
    %138 = arith.addf %136, %137 : vector<8x8xf32>
    %cst_65 = arith.constant 0xFF800000 : f32
    %139 = vector.broadcast %cst_65 : f32 to vector<8x8xf32>
    %140 = arith.select %25, %138, %139 : vector<8x8xi1>, vector<8x8xf32>
    %c0_66 = arith.constant 0 : index
    %c3 = arith.constant 3 : index
    %141 = vector.load %arg11[%c0_66, %c3] : memref<8x4xf32, #tpu.memory_space<vmem>>, vector<8x1xf32>
    %cst_67 = arith.constant dense<0xFF800000> : vector<8xf32>
    %142 = vector.multi_reduction <maximumf>, %140, %cst_67 [1] : vector<8x8xf32> to vector<8xf32>
    %143 = vector.shape_cast %142 : vector<8xf32> to vector<8x1xf32>
    %144 = arith.maximumf %141, %143 : vector<8x1xf32>
    %145 = arith.subf %141, %144 : vector<8x1xf32>
    %146 = math.exp %145 : vector<8x1xf32>
    %147 = vector.extract_strided_slice %8 {offsets = [0, 48], sizes = [8, 16], strides = [1, 1]} : vector<8x64xf32> to vector<8x16xf32>
    %148 = vector.extract_strided_slice %10 {offsets = [0, 48], sizes = [8, 16], strides = [1, 1]} : vector<8x64xf32> to vector<8x16xf32>
    %cst_68 = arith.constant dense<0.000000e+00> : vector<8x8xf32>
    %149 = tpu.matmul %147, %148, %cst_68 {dimension_numbers = #tpu.dot_dimension_numbers<[1], [1], [0], [0], [0, 0, 1, 0], [], []>} : vector<8x16xf32>, vector<8x16xf32>, vector<8x8xf32> -> vector<8x8xf32>
    %cst_69 = arith.constant 2.500000e-01 : f32
    %150 = vector.broadcast %cst_69 : f32 to vector<8x8xf32>
    %151 = arith.mulf %149, %150 : vector<8x8xf32>
    %152 = vector.broadcast %144 : vector<8x1xf32> to vector<8x8xf32>
    %153 = arith.subf %140, %152 : vector<8x8xf32>
    %154 = math.exp %153 : vector<8x8xf32>
    %155 = arith.mulf %151, %154 : vector<8x8xf32>
    %c0_70 = arith.constant 0 : index
    %c3_71 = arith.constant 3 : index
    %156 = vector.load %arg12[%c0_70, %c3_71] : memref<8x4xf32, #tpu.memory_space<vmem>>, vector<8x1xf32>
    %157 = arith.mulf %146, %156 : vector<8x1xf32>
    %cst_72 = arith.constant dense<0.000000e+00> : vector<8xf32>
    %158 = vector.multi_reduction <add>, %155, %cst_72 [1] : vector<8x8xf32> to vector<8xf32>
    %159 = vector.shape_cast %158 : vector<8xf32> to vector<8x1xf32>
    %160 = arith.addf %157, %159 : vector<8x1xf32>
    %c0_73 = arith.constant 0 : index
    %c3_74 = arith.constant 3 : index
    %161 = vector.load %arg12[%c0_73, %c3_74] : memref<8x4xf32, #tpu.memory_space<vmem>>, vector<8x1xf32>
    tpu.vector_store %arg12[%c0_73, %c3_74], %160 {strides = array<i32>} : memref<8x4xf32, #tpu.memory_space<vmem>>, vector<8x1xf32>,
    %c0_75 = arith.constant 0 : index
    %c48 = arith.constant 48 : index
    %162 = vector.load %arg13[%c0_75, %c48] : memref<8x64xf32, #tpu.memory_space<vmem>>, vector<8x16xf32>
    %163 = vector.broadcast %146 : vector<8x1xf32> to vector<8x16xf32>
    %164 = arith.mulf %163, %162 : vector<8x16xf32>
    %165 = vector.extract_strided_slice %12 {offsets = [0, 48], sizes = [8, 16], strides = [1, 1]} : vector<8x64xf32> to vector<8x16xf32>
    %cst_76 = arith.constant dense<0.000000e+00> : vector<8x16xf32>
    %166 = tpu.matmul %155, %165, %cst_76 {dimension_numbers = #tpu.dot_dimension_numbers<[1], [0], [0], [1], [0, 0, 1, 1], [], []>} : vector<8x8xf32>, vector<8x16xf32>, vector<8x16xf32> -> vector<8x16xf32>
    %167 = arith.addf %164, %166 : vector<8x16xf32>
    %c0_77 = arith.constant 0 : index
    %c48_78 = arith.constant 48 : index
    %168 = vector.load %arg13[%c0_77, %c48_78] : memref<8x64xf32, #tpu.memory_space<vmem>>, vector<8x16xf32>
    tpu.vector_store %arg13[%c0_77, %c48_78], %167 {strides = array<i32>} : memref<8x64xf32, #tpu.memory_space<vmem>>, vector<8x16xf32>,
    %c0_79 = arith.constant 0 : index
    %c3_80 = arith.constant 3 : index
    %169 = vector.load %arg11[%c0_79, %c3_80] : memref<8x4xf32, #tpu.memory_space<vmem>>, vector<8x1xf32>
    tpu.vector_store %arg11[%c0_79, %c3_80], %144 {strides = array<i32>} : memref<8x4xf32, #tpu.memory_space<vmem>>, vector<8x1xf32>,
    %170 = arith.cmpi eq, %3, %1 : i32
    %171 = arith.extui %170 : i1 to i32
    %c0_i32_81 = arith.constant 0 : i32
    %172 = arith.cmpi ne, %171, %c0_i32_81 : i32
    scf.if %172 {
      %c0_82 = arith.constant 0 : index
      %c0_83 = arith.constant 0 : index
      %173 = vector.load %arg11[%c0_82, %c0_83] : memref<8x4xf32, #tpu.memory_space<vmem>>, vector<8x1xf32>
      %c0_84 = arith.constant 0 : index
      %c0_85 = arith.constant 0 : index
      %174 = vector.load %arg12[%c0_84, %c0_85] : memref<8x4xf32, #tpu.memory_space<vmem>>, vector<8x1xf32>
      %175 = math.absf %174 : vector<8x1xf32>
      %cst_86 = arith.constant 0.000000e+00 : f32
      %176 = vector.broadcast %cst_86 : f32 to vector<8x1xf32>
      %177 = arith.subf %176, %173 : vector<8x1xf32>
      %178 = math.exp %177 : vector<8x1xf32>
      %179 = arith.maximumf %175, %178 : vector<8x1xf32>
      %c0_87 = arith.constant 0 : index
      %c0_88 = arith.constant 0 : index
      %180 = vector.load %arg13[%c0_87, %c0_88] : memref<8x64xf32, #tpu.memory_space<vmem>>, vector<8x16xf32>
      %cst_89 = arith.constant 9.99999993E-9 : f32
      %181 = vector.broadcast %cst_89 : f32 to vector<8x1xf32>
      %182 = arith.addf %179, %181 : vector<8x1xf32>
      %183 = tpu.reciprocal %182 {approx = true} : vector<8x1xf32> -> vector<8x1xf32>
      %184 = vector.broadcast %183 : vector<8x1xf32> to vector<8x16xf32>
      %185 = arith.mulf %180, %184 : vector<8x16xf32>
      %cst_90 = arith.constant dense<0.000000e+00> : vector<8xf32>
      %186 = vector.multi_reduction <add>, %185, %cst_90 [1] : vector<8x16xf32> to vector<8xf32>
      %187 = vector.shape_cast %186 : vector<8xf32> to vector<8x1xf32>
      %cst_91 = arith.constant 1.600000e+01 : f32
      %188 = vector.broadcast %cst_91 : f32 to vector<8x1xf32>
      %189 = arith.divf %187, %188 : vector<8x1xf32>
      %190 = vector.broadcast %189 : vector<8x1xf32> to vector<8x16xf32>
      %191 = arith.subf %185, %190 : vector<8x16xf32>
      %192 = arith.mulf %191, %191 : vector<8x16xf32>
      %cst_92 = arith.constant dense<0.000000e+00> : vector<8xf32>
      %193 = vector.multi_reduction <add>, %192, %cst_92 [1] : vector<8x16xf32> to vector<8xf32>
      %194 = vector.shape_cast %193 : vector<8xf32> to vector<8x1xf32>
      %cst_93 = arith.constant 1.600000e+01 : f32
      %195 = vector.broadcast %cst_93 : f32 to vector<8x1xf32>
      %196 = arith.divf %194, %195 : vector<8x1xf32>
      %cst_94 = arith.constant 9.99999974E-6 : f32
      %197 = vector.broadcast %cst_94 : f32 to vector<8x1xf32>
      %198 = arith.addf %196, %197 : vector<8x1xf32>
      %199 = math.rsqrt %198 : vector<8x1xf32>
      %200 = vector.broadcast %199 : vector<8x1xf32> to vector<8x16xf32>
      %201 = arith.mulf %191, %200 : vector<8x16xf32>
      %c0_95 = arith.constant 0 : index
      %c0_96 = arith.constant 0 : index
      %202 = vector.load %arg13[%c0_95, %c0_96] : memref<8x64xf32, #tpu.memory_space<vmem>>, vector<8x16xf32>
      tpu.vector_store %arg13[%c0_95, %c0_96], %201 {strides = array<i32>} : memref<8x64xf32, #tpu.memory_space<vmem>>, vector<8x16xf32>,
      %c0_97 = arith.constant 0 : index
      %c1_98 = arith.constant 1 : index
      %203 = vector.load %arg11[%c0_97, %c1_98] : memref<8x4xf32, #tpu.memory_space<vmem>>, vector<8x1xf32>
      %c0_99 = arith.constant 0 : index
      %c1_100 = arith.constant 1 : index
      %204 = vector.load %arg12[%c0_99, %c1_100] : memref<8x4xf32, #tpu.memory_space<vmem>>, vector<8x1xf32>
      %205 = math.absf %204 : vector<8x1xf32>
      %cst_101 = arith.constant 0.000000e+00 : f32
      %206 = vector.broadcast %cst_101 : f32 to vector<8x1xf32>
      %207 = arith.subf %206, %203 : vector<8x1xf32>
      %208 = math.exp %207 : vector<8x1xf32>
      %209 = arith.maximumf %205, %208 : vector<8x1xf32>
      %c0_102 = arith.constant 0 : index
      %c16_103 = arith.constant 16 : index
      %210 = vector.load %arg13[%c0_102, %c16_103] : memref<8x64xf32, #tpu.memory_space<vmem>>, vector<8x16xf32>
      %cst_104 = arith.constant 9.99999993E-9 : f32
      %211 = vector.broadcast %cst_104 : f32 to vector<8x1xf32>
      %212 = arith.addf %209, %211 : vector<8x1xf32>
      %213 = tpu.reciprocal %212 {approx = true} : vector<8x1xf32> -> vector<8x1xf32>
      %214 = vector.broadcast %213 : vector<8x1xf32> to vector<8x16xf32>
      %215 = arith.mulf %210, %214 : vector<8x16xf32>
      %cst_105 = arith.constant dense<0.000000e+00> : vector<8xf32>
      %216 = vector.multi_reduction <add>, %215, %cst_105 [1] : vector<8x16xf32> to vector<8xf32>
      %217 = vector.shape_cast %216 : vector<8xf32> to vector<8x1xf32>
      %cst_106 = arith.constant 1.600000e+01 : f32
      %218 = vector.broadcast %cst_106 : f32 to vector<8x1xf32>
      %219 = arith.divf %217, %218 : vector<8x1xf32>
      %220 = vector.broadcast %219 : vector<8x1xf32> to vector<8x16xf32>
      %221 = arith.subf %215, %220 : vector<8x16xf32>
      %222 = arith.mulf %221, %221 : vector<8x16xf32>
      %cst_107 = arith.constant dense<0.000000e+00> : vector<8xf32>
      %223 = vector.multi_reduction <add>, %222, %cst_107 [1] : vector<8x16xf32> to vector<8xf32>
      %224 = vector.shape_cast %223 : vector<8xf32> to vector<8x1xf32>
      %cst_108 = arith.constant 1.600000e+01 : f32
      %225 = vector.broadcast %cst_108 : f32 to vector<8x1xf32>
      %226 = arith.divf %224, %225 : vector<8x1xf32>
      %cst_109 = arith.constant 9.99999974E-6 : f32
      %227 = vector.broadcast %cst_109 : f32 to vector<8x1xf32>
      %228 = arith.addf %226, %227 : vector<8x1xf32>
      %229 = math.rsqrt %228 : vector<8x1xf32>
      %230 = vector.broadcast %229 : vector<8x1xf32> to vector<8x16xf32>
      %231 = arith.mulf %221, %230 : vector<8x16xf32>
      %c0_110 = arith.constant 0 : index
      %c16_111 = arith.constant 16 : index
      %232 = vector.load %arg13[%c0_110, %c16_111] : memref<8x64xf32, #tpu.memory_space<vmem>>, vector<8x16xf32>
      tpu.vector_store %arg13[%c0_110, %c16_111], %231 {strides = array<i32>} : memref<8x64xf32, #tpu.memory_space<vmem>>, vector<8x16xf32>,
      %c0_112 = arith.constant 0 : index
      %c2_113 = arith.constant 2 : index
      %233 = vector.load %arg11[%c0_112, %c2_113] : memref<8x4xf32, #tpu.memory_space<vmem>>, vector<8x1xf32>
      %c0_114 = arith.constant 0 : index
      %c2_115 = arith.constant 2 : index
      %234 = vector.load %arg12[%c0_114, %c2_115] : memref<8x4xf32, #tpu.memory_space<vmem>>, vector<8x1xf32>
      %235 = math.absf %234 : vector<8x1xf32>
      %cst_116 = arith.constant 0.000000e+00 : f32
      %236 = vector.broadcast %cst_116 : f32 to vector<8x1xf32>
      %237 = arith.subf %236, %233 : vector<8x1xf32>
      %238 = math.exp %237 : vector<8x1xf32>
      %239 = arith.maximumf %235, %238 : vector<8x1xf32>
      %c0_117 = arith.constant 0 : index
      %c32_118 = arith.constant 32 : index
      %240 = vector.load %arg13[%c0_117, %c32_118] : memref<8x64xf32, #tpu.memory_space<vmem>>, vector<8x16xf32>
      %cst_119 = arith.constant 9.99999993E-9 : f32
      %241 = vector.broadcast %cst_119 : f32 to vector<8x1xf32>
      %242 = arith.addf %239, %241 : vector<8x1xf32>
      %243 = tpu.reciprocal %242 {approx = true} : vector<8x1xf32> -> vector<8x1xf32>
      %244 = vector.broadcast %243 : vector<8x1xf32> to vector<8x16xf32>
      %245 = arith.mulf %240, %244 : vector<8x16xf32>
      %cst_120 = arith.constant dense<0.000000e+00> : vector<8xf32>
      %246 = vector.multi_reduction <add>, %245, %cst_120 [1] : vector<8x16xf32> to vector<8xf32>
      %247 = vector.shape_cast %246 : vector<8xf32> to vector<8x1xf32>
      %cst_121 = arith.constant 1.600000e+01 : f32
      %248 = vector.broadcast %cst_121 : f32 to vector<8x1xf32>
      %249 = arith.divf %247, %248 : vector<8x1xf32>
      %250 = vector.broadcast %249 : vector<8x1xf32> to vector<8x16xf32>
      %251 = arith.subf %245, %250 : vector<8x16xf32>
      %252 = arith.mulf %251, %251 : vector<8x16xf32>
      %cst_122 = arith.constant dense<0.000000e+00> : vector<8xf32>
      %253 = vector.multi_reduction <add>, %252, %cst_122 [1] : vector<8x16xf32> to vector<8xf32>
      %254 = vector.shape_cast %253 : vector<8xf32> to vector<8x1xf32>
      %cst_123 = arith.constant 1.600000e+01 : f32
      %255 = vector.broadcast %cst_123 : f32 to vector<8x1xf32>
      %256 = arith.divf %254, %255 : vector<8x1xf32>
      %cst_124 = arith.constant 9.99999974E-6 : f32
      %257 = vector.broadcast %cst_124 : f32 to vector<8x1xf32>
      %258 = arith.addf %256, %257 : vector<8x1xf32>
      %259 = math.rsqrt %258 : vector<8x1xf32>
      %260 = vector.broadcast %259 : vector<8x1xf32> to vector<8x16xf32>
      %261 = arith.mulf %251, %260 : vector<8x16xf32>
      %c0_125 = arith.constant 0 : index
      %c32_126 = arith.constant 32 : index
      %262 = vector.load %arg13[%c0_125, %c32_126] : memref<8x64xf32, #tpu.memory_space<vmem>>, vector<8x16xf32>
      tpu.vector_store %arg13[%c0_125, %c32_126], %261 {strides = array<i32>} : memref<8x64xf32, #tpu.memory_space<vmem>>, vector<8x16xf32>,
      %c0_127 = arith.constant 0 : index
      %c3_128 = arith.constant 3 : index
      %263 = vector.load %arg11[%c0_127, %c3_128] : memref<8x4xf32, #tpu.memory_space<vmem>>, vector<8x1xf32>
      %c0_129 = arith.constant 0 : index
      %c3_130 = arith.constant 3 : index
      %264 = vector.load %arg12[%c0_129, %c3_130] : memref<8x4xf32, #tpu.memory_space<vmem>>, vector<8x1xf32>
      %265 = math.absf %264 : vector<8x1xf32>
      %cst_131 = arith.constant 0.000000e+00 : f32
      %266 = vector.broadcast %cst_131 : f32 to vector<8x1xf32>
      %267 = arith.subf %266, %263 : vector<8x1xf32>
      %268 = math.exp %267 : vector<8x1xf32>
      %269 = arith.maximumf %265, %268 : vector<8x1xf32>
      %c0_132 = arith.constant 0 : index
      %c48_133 = arith.constant 48 : index
      %270 = vector.load %arg13[%c0_132, %c48_133] : memref<8x64xf32, #tpu.memory_space<vmem>>, vector<8x16xf32>
      %cst_134 = arith.constant 9.99999993E-9 : f32
      %271 = vector.broadcast %cst_134 : f32 to vector<8x1xf32>
      %272 = arith.addf %269, %271 : vector<8x1xf32>
      %273 = tpu.reciprocal %272 {approx = true} : vector<8x1xf32> -> vector<8x1xf32>
      %274 = vector.broadcast %273 : vector<8x1xf32> to vector<8x16xf32>
      %275 = arith.mulf %270, %274 : vector<8x16xf32>
      %cst_135 = arith.constant dense<0.000000e+00> : vector<8xf32>
      %276 = vector.multi_reduction <add>, %275, %cst_135 [1] : vector<8x16xf32> to vector<8xf32>
      %277 = vector.shape_cast %276 : vector<8xf32> to vector<8x1xf32>
      %cst_136 = arith.constant 1.600000e+01 : f32
      %278 = vector.broadcast %cst_136 : f32 to vector<8x1xf32>
      %279 = arith.divf %277, %278 : vector<8x1xf32>
      %280 = vector.broadcast %279 : vector<8x1xf32> to vector<8x16xf32>
      %281 = arith.subf %275, %280 : vector<8x16xf32>
      %282 = arith.mulf %281, %281 : vector<8x16xf32>
      %cst_137 = arith.constant dense<0.000000e+00> : vector<8xf32>
      %283 = vector.multi_reduction <add>, %282, %cst_137 [1] : vector<8x16xf32> to vector<8xf32>
      %284 = vector.shape_cast %283 : vector<8xf32> to vector<8x1xf32>
      %cst_138 = arith.constant 1.600000e+01 : f32
      %285 = vector.broadcast %cst_138 : f32 to vector<8x1xf32>
      %286 = arith.divf %284, %285 : vector<8x1xf32>
      %cst_139 = arith.constant 9.99999974E-6 : f32
      %287 = vector.broadcast %cst_139 : f32 to vector<8x1xf32>
      %288 = arith.addf %286, %287 : vector<8x1xf32>
      %289 = math.rsqrt %288 : vector<8x1xf32>
      %290 = vector.broadcast %289 : vector<8x1xf32> to vector<8x16xf32>
      %291 = arith.mulf %281, %290 : vector<8x16xf32>
      %c0_140 = arith.constant 0 : index
      %c48_141 = arith.constant 48 : index
      %292 = vector.load %arg13[%c0_140, %c48_141] : memref<8x64xf32, #tpu.memory_space<vmem>>, vector<8x16xf32>
      tpu.vector_store %arg13[%c0_140, %c48_141], %291 {strides = array<i32>} : memref<8x64xf32, #tpu.memory_space<vmem>>, vector<8x16xf32>,
      %c0_142 = arith.constant 0 : index
      %c0_143 = arith.constant 0 : index
      %293 = vector.load %arg13[%c0_142, %c0_143] : memref<8x64xf32, #tpu.memory_space<vmem>>, vector<8x64xf32>
      %c0_144 = arith.constant 0 : index
      %c0_145 = arith.constant 0 : index
      %294 = vector.load %arg9[%c0_144, %c0_145] : memref<1x64xf32, #tpu.memory_space<vmem>>, vector<1x64xf32>
      %295 = vector.broadcast %294 : vector<1x64xf32> to vector<8x64xf32>
      %296 = arith.mulf %293, %295 : vector<8x64xf32>
      %c0_146 = arith.constant 0 : index
      %c0_147 = arith.constant 0 : index
      %c0_148 = arith.constant 0 : index
      %297 = vector.load %arg10[%c0_146, %c0_147, %c0_148] : memref<1x8x64xf32, #tpu.memory_space<vmem>>, vector<1x8x64xf32>
      %298 = vector.shape_cast %297 : vector<1x8x64xf32> to vector<8x64xf32>
      %299 = vector.shape_cast %296 : vector<8x64xf32> to vector<1x8x64xf32>
      tpu.vector_store %arg10[%c0_146, %c0_147, %c0_148], %299 {strides = array<i32>} : memref<1x8x64xf32, #tpu.memory_space<vmem>>, vector<1x8x64xf32>,
    } else {
    }
    return
  }
  func.func @transform_0(%arg0: i32, %arg1: i32, %arg2: memref<1xi32, #tpu.memory_space<smem>>, %arg3: memref<1xi32, #tpu.memory_space<smem>>) -> (i32, i32, i32) {
    %0 = arith.index_cast %arg1 : i32 to index
    %1 = memref.load %arg2[%0] : memref<1xi32, #tpu.memory_space<smem>>
    %c0_i32 = arith.constant 0 : i32
    %c0_i32_0 = arith.constant 0 : i32
    return %arg0, %1, %c0_i32 : i32, i32, i32
  }
  func.func @transform_1(%arg0: i32, %arg1: i32, %arg2: memref<1xi32, #tpu.memory_space<smem>>, %arg3: memref<1xi32, #tpu.memory_space<smem>>) -> (i32, i32, i32) {
    %0 = arith.index_cast %arg1 : i32 to index
    %1 = memref.load %arg3[%0] : memref<1xi32, #tpu.memory_space<smem>>
    %c0_i32 = arith.constant 0 : i32
    %c0_i32_0 = arith.constant 0 : i32
    return %arg0, %1, %c0_i32 : i32, i32, i32
  }
  func.func @transform_2(%arg0: i32, %arg1: i32, %arg2: memref<1xi32, #tpu.memory_space<smem>>, %arg3: memref<1xi32, #tpu.memory_space<smem>>) -> (i32, i32, i32) {
    %0 = arith.index_cast %arg1 : i32 to index
    %1 = memref.load %arg3[%0] : memref<1xi32, #tpu.memory_space<smem>>
    %c0_i32 = arith.constant 0 : i32
    %c0_i32_0 = arith.constant 0 : i32
    return %arg0, %1, %c0_i32 : i32, i32, i32
  }
  func.func @transform_3(%arg0: i32, %arg1: i32, %arg2: memref<1xi32, #tpu.memory_space<smem>>, %arg3: memref<1xi32, #tpu.memory_space<smem>>) -> (i32, i32, i32) {
    %0 = arith.index_cast %arg1 : i32 to index
    %1 = memref.load %arg3[%0] : memref<1xi32, #tpu.memory_space<smem>>
    %c0_i32 = arith.constant 0 : i32
    %c0_i32_0 = arith.constant 0 : i32
    return %arg0, %c0_i32, %1 : i32, i32, i32
  }
  func.func @transform_4(%arg0: i32, %arg1: i32, %arg2: memref<1xi32, #tpu.memory_space<smem>>, %arg3: memref<1xi32, #tpu.memory_space<smem>>) -> (i32, i32, i32) {
    %0 = arith.index_cast %arg1 : i32 to index
    %1 = memref.load %arg2[%0] : memref<1xi32, #tpu.memory_space<smem>>
    %c0_i32 = arith.constant 0 : i32
    %c0_i32_0 = arith.constant 0 : i32
    return %arg0, %1, %c0_i32 : i32, i32, i32
  }
  func.func @transform_5(%arg0: i32, %arg1: i32, %arg2: memref<1xi32, #tpu.memory_space<smem>>, %arg3: memref<1xi32, #tpu.memory_space<smem>>) -> (i32, i32) {
    %c0_i32 = arith.constant 0 : i32
    %c0_i32_0 = arith.constant 0 : i32
    %c0_i32_1 = arith.constant 0 : i32
    return %c0_i32, %c0_i32_0 : i32, i32
  }
  func.func @transform_6(%arg0: i32, %arg1: i32, %arg2: memref<1xi32, #tpu.memory_space<smem>>, %arg3: memref<1xi32, #tpu.memory_space<smem>>) -> (i32, i32, i32) {
    %0 = arith.index_cast %arg1 : i32 to index
    %1 = memref.load %arg2[%0] : memref<1xi32, #tpu.memory_space<smem>>
    %c0_i32 = arith.constant 0 : i32
    %c0_i32_0 = arith.constant 0 : i32
    return %arg0, %1, %c0_i32 : i32, i32, i32
  }
}

module attributes {stable_mosaic.version = 11 : i64} {
  func.func @_finalize_kernel(%arg0: i32, %arg1: i32, %arg2: memref<16x64xf32, #tpu.memory_space<vmem>>, %arg3: memref<16x64xf32, #tpu.memory_space<vmem>>, %arg4: memref<16x64xf32, #tpu.memory_space<vmem>>, %arg5: memref<1x64xf32, #tpu.memory_space<vmem>>, %arg6: memref<64x32xf32, #tpu.memory_space<vmem>>, %arg7: memref<16x32xf32, #tpu.memory_space<vmem>>, %arg8: memref<16x32xf32, #tpu.memory_space<vmem>>) attributes {dimension_semantics = [#tpu.dimension_semantics<parallel>, #tpu.dimension_semantics<arbitrary>], iteration_bounds = array<i64: 1, 1>, scalar_prefetch = 0 : i64, scratch_operands = 1 : i64, tpu.core_type = #tpu.core_type<tc>, window_params = [{transform_indices = @transform_0, window_bounds = array<i64: 16, 64>}, {transform_indices = @transform_1, window_bounds = array<i64: 16, 64>}, {transform_indices = @transform_2, window_bounds = array<i64: 16, 64>}, {transform_indices = @transform_3, window_bounds = array<i64: 1, 64>}, {transform_indices = @transform_4, window_bounds = array<i64: 64, 32>}, {transform_indices = @transform_5, window_bounds = array<i64: 16, 32>}]} {
    %c0_i32 = arith.constant 0 : i32
    %0 = arith.cmpi eq, %arg1, %c0_i32 : i32
    %1 = arith.extui %0 : i1 to i32
    %c0_i32_0 = arith.constant 0 : i32
    %2 = arith.cmpi ne, %1, %c0_i32_0 : i32
    scf.if %2 {
      %cst_17 = arith.constant 0.000000e+00 : f32
      %25 = vector.broadcast %cst_17 : f32 to vector<16x32xf32>
      %c0_18 = arith.constant 0 : index
      %c0_19 = arith.constant 0 : index
      %26 = vector.load %arg8[%c0_18, %c0_19] : memref<16x32xf32, #tpu.memory_space<vmem>>, vector<16x32xf32>
      tpu.vector_store %arg8[%c0_18, %c0_19], %25 {strides = array<i32>} : memref<16x32xf32, #tpu.memory_space<vmem>>, vector<16x32xf32>,
    } else {
    }
    %c0 = arith.constant 0 : index
    %c0_1 = arith.constant 0 : index
    %3 = vector.load %arg4[%c0, %c0_1] : memref<16x64xf32, #tpu.memory_space<vmem>>, vector<16x64xf32>
    %c0_2 = arith.constant 0 : index
    %c0_3 = arith.constant 0 : index
    %4 = vector.load %arg2[%c0_2, %c0_3] : memref<16x64xf32, #tpu.memory_space<vmem>>, vector<16x64xf32>
    %c0_4 = arith.constant 0 : index
    %c0_5 = arith.constant 0 : index
    %5 = vector.load %arg5[%c0_4, %c0_5] : memref<1x64xf32, #tpu.memory_space<vmem>>, vector<1x64xf32>
    %c0_6 = arith.constant 0 : index
    %c0_7 = arith.constant 0 : index
    %6 = vector.load %arg3[%c0_6, %c0_7] : memref<16x64xf32, #tpu.memory_space<vmem>>, vector<16x64xf32>
    %7 = vector.broadcast %5 : vector<1x64xf32> to vector<16x64xf32>
    %8 = arith.mulf %7, %6 : vector<16x64xf32>
    %9 = arith.addf %4, %8 : vector<16x64xf32>
    %10 = arith.negf %3 : vector<16x64xf32>
    %11 = math.exp %10 : vector<16x64xf32>
    %cst = arith.constant 1.000000e+00 : f32
    %12 = vector.broadcast %cst : f32 to vector<16x64xf32>
    %13 = arith.addf %12, %11 : vector<16x64xf32>
    %14 = arith.divf %12, %13 : vector<16x64xf32>
    %15 = arith.mulf %3, %14 : vector<16x64xf32>
    %16 = arith.mulf %9, %15 : vector<16x64xf32>
    %c0_8 = arith.constant 0 : index
    %c0_9 = arith.constant 0 : index
    %17 = vector.load %arg8[%c0_8, %c0_9] : memref<16x32xf32, #tpu.memory_space<vmem>>, vector<16x32xf32>
    %c0_10 = arith.constant 0 : index
    %c0_11 = arith.constant 0 : index
    %18 = vector.load %arg6[%c0_10, %c0_11] : memref<64x32xf32, #tpu.memory_space<vmem>>, vector<64x32xf32>
    %cst_12 = arith.constant dense<0.000000e+00> : vector<16x32xf32>
    %19 = tpu.matmul %16, %18, %cst_12 {dimension_numbers = #tpu.dot_dimension_numbers<[1], [0], [0], [1], [0, 0, 1, 1], [], []>} : vector<16x64xf32>, vector<64x32xf32>, vector<16x32xf32> -> vector<16x32xf32>
    %20 = arith.addf %17, %19 : vector<16x32xf32>
    %c0_13 = arith.constant 0 : index
    %c0_14 = arith.constant 0 : index
    %21 = vector.load %arg8[%c0_13, %c0_14] : memref<16x32xf32, #tpu.memory_space<vmem>>, vector<16x32xf32>
    tpu.vector_store %arg8[%c0_13, %c0_14], %20 {strides = array<i32>} : memref<16x32xf32, #tpu.memory_space<vmem>>, vector<16x32xf32>,
    %c0_i32_15 = arith.constant 0 : i32
    %22 = arith.cmpi eq, %arg1, %c0_i32_15 : i32
    %23 = arith.extui %22 : i1 to i32
    %c0_i32_16 = arith.constant 0 : i32
    %24 = arith.cmpi ne, %23, %c0_i32_16 : i32
    scf.if %24 {
      %c0_17 = arith.constant 0 : index
      %c0_18 = arith.constant 0 : index
      %25 = vector.load %arg8[%c0_17, %c0_18] : memref<16x32xf32, #tpu.memory_space<vmem>>, vector<16x32xf32>
      %c0_19 = arith.constant 0 : index
      %c0_20 = arith.constant 0 : index
      %26 = vector.load %arg7[%c0_19, %c0_20] : memref<16x32xf32, #tpu.memory_space<vmem>>, vector<16x32xf32>
      tpu.vector_store %arg7[%c0_19, %c0_20], %25 {strides = array<i32>} : memref<16x32xf32, #tpu.memory_space<vmem>>, vector<16x32xf32>,
    } else {
    }
    return
  }
  func.func @transform_0(%arg0: i32, %arg1: i32) -> (i32, i32) {
    %c0_i32 = arith.constant 0 : i32
    return %arg0, %arg1 : i32, i32
  }
  func.func @transform_1(%arg0: i32, %arg1: i32) -> (i32, i32) {
    %c0_i32 = arith.constant 0 : i32
    return %arg0, %arg1 : i32, i32
  }
  func.func @transform_2(%arg0: i32, %arg1: i32) -> (i32, i32) {
    %c0_i32 = arith.constant 0 : i32
    return %arg0, %arg1 : i32, i32
  }
  func.func @transform_3(%arg0: i32, %arg1: i32) -> (i32, i32) {
    %c0_i32 = arith.constant 0 : i32
    %c0_i32_0 = arith.constant 0 : i32
    return %c0_i32, %arg1 : i32, i32
  }
  func.func @transform_4(%arg0: i32, %arg1: i32) -> (i32, i32) {
    %c0_i32 = arith.constant 0 : i32
    %c0_i32_0 = arith.constant 0 : i32
    return %arg1, %c0_i32 : i32, i32
  }
  func.func @transform_5(%arg0: i32, %arg1: i32) -> (i32, i32) {
    %c0_i32 = arith.constant 0 : i32
    %c0_i32_0 = arith.constant 0 : i32
    return %arg0, %c0_i32 : i32, i32
  }
}

</mosaic_0001>

<bundles_post_ra>
// kernel: mlstm_layer_forward.5
= control target key start
LH: loop header
LB: loop body
LE: loop exit
PB: predicated region body
PF: predicated region fallthrough
CT: control target
= control target key end

     0   :  { %7 = vsyncpa [#allocation4], 0  ;;  %s181_s9 = smov [#allocation3]   ;;  %s216_s0 = inlined_call_operand.vmem [shape: f32[16,32], index: 0, kind: input, shape index: {}]   ;;  %s217_s1 = inlined_call_operand.hbm [shape: f32[32,128], index: 1, kind: input, shape index: {}]   ;;  %s218_s2 = inlined_call_operand.vmem [shape: f32[16,128], index: 2, kind: output, shape index: {}]  }
   0x1   :  { %s15_s10 = sshll.u32 %s181_s9, 4  ;;  %s16_s10 = int_to_ptr.vmem [resolvable:$true] %s15_s10 }
   0x2   :  { %s167_s11 = scalar_lea.vmem %s16_s10, 512  ;;  %p172_p1 = scmp.lt.s32.totalorder %s16_s10, %s16_s10 }
   0x3   :  { %p168_p0 = scmp.ne.s32.totalorder %s16_s10, %s167_s11  ;;  %p173_p2 = scmp.lt.s32.totalorder %s167_s11, %s167_s11 }
   0x5   :  { %p174_p3 = por %p173_p2, %p172_p1 }
   0x7   :  { %p175_p4 = pnand %p174_p3, %p168_p0 }
   0x9   :  { %178 = shalt.err (!%p175_p4)
}
   0xa   :  { %s182_s12 = smov 128   ;;  %s183_s13 = smov 8  }
   0xb   :  { %21 = dma.hbm_to_vmem [thread:$0]  %s217_s1, 512, %s16_s10, [#allocation4], %s182_s12, %s182_s12, %s183_s13  }
   0xc   :  { %179 = dma.done.wait [#allocation4], 512  }
   0xd   :  { %180 = vsyncadd [#allocation4], 4294966784  ;;  %vm39_vm0 = vcmask 261120   ;;  %v38_v0 = vld [vmem:[#allocation3 + $0x18] sm:$0xff]  ;;  %v37_v1 = vld [vmem:[#allocation3 + $0x10] sm:$0xff] }
   0xe   :  { %145 = vmatprep.subr.mxu0 %v38_v0  ;;  %v33_v2 = vld [vmem:[%s216_s0] sm:$0xff]  ;;  %v36_v3 = vld [vmem:[#allocation3 + $0x8] sm:$0xff] }
   0xf   :  { %146 = vmatpush3.msra.mxu0 %v38_v0  ;;  %153 = vmatprep.mubr.msk.f32.mxu0 %vm39_vm0, %v33_v2  ;;  %v35_v4 = vld [vmem:[#allocation3] sm:$0xff]  ;;  %v34_v5 = vld [vmem:[%s216_s0 + $0x8] sm:$0xff] }
  0x10   :  { %147 = vmatprep.subr.mxu0 %v37_v1 }
  0x11   :  { %148 = vmatpush3.msra.mxu0 %v37_v1 }
  0x12   :  { %149 = vmatprep.subr.mxu0 %v36_v3 }
  0x13   :  { %150 = vmatpush3.msra.mxu0 %v36_v3 }
  0x14   :  { %151 = vmatprep.subr.mxu0 %v35_v4 }
  0x15   :  { %152 = vmatpush3.msra.mxu0 %v35_v4 }
  0x16   :  { %154 = vmatmul.mubr.msk.f32.vlgmr.msra.gmra.mxu0 %vm39_vm0, %v34_v5 }
  0xd6   :  { %v155_v6 = vpop.f32.mrf.mxu0 }
  0xd7   :  { %131 = vst [vmem:[%s218_s2 + $0x8] sm:$0xff] %v155_v6 }
  0xd8   :  { %v112_v7 = vpop.f32.mrf.mxu0 }
  0xd9   :  { %130 = vst [vmem:[%s218_s2] sm:$0xff] %v112_v7 }
  0xda   :  { %136 = vsyncpa [#allocation4], 1 }

// kernel: mlstm_layer_forward.6
= control target key start
LH: loop header
LB: loop body
LE: loop exit
PB: predicated region body
PF: predicated region fallthrough
CT: control target
= control target key end

     0   :  { %vm29_vm0 = vcmask 523264   ;;  %s210_s1 = inlined_call_operand.vmem [shape: f32[64,128], index: 1, kind: input, shape index: {}]   ;;  %s211_s0 = inlined_call_operand.vmem [shape: f32[16,64], index: 0, kind: input, shape index: {}]   ;;  %s212_s2 = inlined_call_operand.vmem [shape: f32[16,128], index: 2, kind: output, shape index: {}]  }
   0x1   :  { %v28_v0 = vld [vmem:[%s210_s1 + $0x38] sm:$0xff]  ;;  %v27_v1 = vld [vmem:[%s210_s1 + $0x30] sm:$0xff]  ;;  %v26_v2 = vld [vmem:[%s210_s1 + $0x28] sm:$0xff] }
   0x2   :  { %138 = vmatprep.subr.mxu0 %v28_v0  ;;  %v19_v3 = vld [vmem:[%s211_s0] sm:$0xff]  ;;  %v24_v5 = vld [vmem:[%s210_s1 + $0x18] sm:$0xff]  ;;  %v23_v6 = vld [vmem:[%s210_s1 + $0x10] sm:$0xff] }
   0x3   :  { %139 = vmatpush3.msra.mxu0 %v28_v0  ;;  %154 = vmatprep.mubr.msk.f32.mxu0 %vm29_vm0, %v19_v3  ;;  %v25_v4 = vld [vmem:[%s210_s1 + $0x20] sm:$0xff]  ;;  %v22_v7 = vld [vmem:[%s210_s1 + $0x8] sm:$0xff] }
   0x4   :  { %140 = vmatprep.subr.mxu0 %v27_v1  ;;  %v21_v8 = vld [vmem:[%s210_s1] sm:$0xff]  ;;  %v20_v9 = vld [vmem:[%s211_s0 + $0x8] sm:$0xff] }
   0x5   :  { %141 = vmatpush3.msra.mxu0 %v27_v1 }
   0x6   :  { %142 = vmatprep.subr.mxu0 %v26_v2 }
   0x7   :  { %143 = vmatpush3.msra.mxu0 %v26_v2 }
   0x8   :  { %144 = vmatprep.subr.mxu0 %v25_v4 }
   0x9   :  { %145 = vmatpush3.msra.mxu0 %v25_v4 }
   0xa   :  { %146 = vmatprep.subr.mxu0 %v24_v5 }
   0xb   :  { %147 = vmatpush3.msra.mxu0 %v24_v5 }
   0xc   :  { %148 = vmatprep.subr.mxu0 %v23_v6 }
   0xd   :  { %149 = vmatpush3.msra.mxu0 %v23_v6 }
   0xe   :  { %150 = vmatprep.subr.mxu0 %v22_v7 }
   0xf   :  { %151 = vmatpush3.msra.mxu0 %v22_v7 }
  0x10   :  { %152 = vmatprep.subr.mxu0 %v21_v8 }
  0x11   :  { %153 = vmatpush3.msra.mxu0 %v21_v8 }
  0x12   :  { %155 = vmatmul.mubr.msk.f32.vlgmr.msra.gmra.mxu0 %vm29_vm0, %v20_v9 }
  0xd2   :  { %v156_v10 = vpop.f32.mrf.mxu0 }
  0xd3   :  { %121 = vst [vmem:[%s212_s2 + $0x8] sm:$0xff] %v156_v10 }
  0xd4   :  { %v102_v11 = vpop.f32.mrf.mxu0 }
  0xd5   :  { %120 = vst [vmem:[%s212_s2] sm:$0xff] %v102_v11 }

// kernel: mlstm_layer_forward.7
= control target key start
LH: loop header
LB: loop body
LE: loop exit
PB: predicated region body
PF: predicated region fallthrough
CT: control target
= control target key end

     0   :  { %vm15_vm0 = vcmask 523264   ;;  %v159_v2 = vmov 0.0   ;;  %s219_s1 = inlined_call_operand.vmem [shape: f32[64,64], index: 1, kind: input, shape index: {}]   ;;  %s220_s0 = inlined_call_operand.vmem [shape: f32[16,64], index: 0, kind: input, shape index: {}]   ;;  %s221_s2 = inlined_call_operand.vmem [shape: f32[16,64], index: 2, kind: output, shape index: {}]  }
   0x1   :  { %v29_v0 = vld [vmem:[%s219_s1 + $0x38] sm:$0xff]  ;;  %v28_v1 = vld [vmem:[%s219_s1 + $0x30] sm:$0xff]  ;;  %17 = vst.msk [vmem:[#allocation2 + $0x8] sm:$0xff] %vm15_vm0, %v159_v2  ;;  %16 = vst.msk [vmem:[#allocation2] sm:$0xff] %vm15_vm0, %v159_v2 }
   0x2   :  { %139 = vmatprep.subr.mxu0 %v29_v0  ;;  %v27_v3 = vld [vmem:[%s219_s1 + $0x28] sm:$0xff]  ;;  %v20_v4 = vld [vmem:[%s220_s0] sm:$0xff]  ;;  %v25_v6 = vld [vmem:[%s219_s1 + $0x18] sm:$0xff] }
   0x3   :  { %140 = vmatpush3.msra.mxu0 %v29_v0  ;;  %155 = vmatprep.mubr.msk.f32.mxu0 %vm15_vm0, %v20_v4  ;;  %v26_v5 = vld [vmem:[%s219_s1 + $0x20] sm:$0xff]  ;;  %v24_v7 = vld [vmem:[%s219_s1 + $0x10] sm:$0xff]  ;;  %v23_v8 = vld [vmem:[%s219_s1 + $0x8] sm:$0xff] }
   0x4   :  { %141 = vmatprep.subr.mxu0 %v28_v1  ;;  %v22_v9 = vld [vmem:[%s219_s1] sm:$0xff]  ;;  %v21_v10 = vld [vmem:[%s220_s0 + $0x8] sm:$0xff] }
   0x5   :  { %142 = vmatpush3.msra.mxu0 %v28_v1 }
   0x6   :  { %143 = vmatprep.subr.mxu0 %v27_v3 }
   0x7   :  { %144 = vmatpush3.msra.mxu0 %v27_v3 }
   0x8   :  { %145 = vmatprep.subr.mxu0 %v26_v5  ;;  %v19_v11 = vld [vmem:[#allocation2 + $0x8] sm:$0xff]  ;;  %v18_v13 = vld [vmem:[#allocation2] sm:$0xff] }
   0x9   :  { %146 = vmatpush3.msra.mxu0 %v26_v5 }
   0xa   :  { %147 = vmatprep.subr.mxu0 %v25_v6 }
   0xb   :  { %148 = vmatpush3.msra.mxu0 %v25_v6 }
   0xc   :  { %149 = vmatprep.subr.mxu0 %v24_v7 }
   0xd   :  { %150 = vmatpush3.msra.mxu0 %v24_v7 }
   0xe   :  { %151 = vmatprep.subr.mxu0 %v23_v8 }
   0xf   :  { %152 = vmatpush3.msra.mxu0 %v23_v8 }
  0x10   :  { %153 = vmatprep.subr.mxu0 %v22_v9 }
  0x11   :  { %154 = vmatpush3.msra.mxu0 %v22_v9 }
  0x12   :  { %156 = vmatmul.mubr.msk.f32.vlgmr.msra.gmra.mxu0 %vm15_vm0, %v21_v10 }
  0xd2   :  { %v157_v12 = vpop.f32.mrf.mxu0 }
  0xd3   :  { %v113_v14 = vadd.f32 %v157_v12, %v19_v11 }
  0xd4   :  { %v103_v15 = vpop.f32.mrf.mxu0 }
  0xd5   :  { %115 = vst.msk [vmem:[#allocation2 + $0x8] sm:$0xff] %vm15_vm0, %v113_v14  ;;  %v112_v16 = vadd.f32 %v103_v15, %v18_v13 }
  0xd7   :  { %114 = vst.msk [vmem:[#allocation2] sm:$0xff] %vm15_vm0, %v112_v16 }
  0xdc   :  { %v120_v17 = vld [vmem:[#allocation2 + $0x8] sm:$0xff] }
  0xdd   :  { %122 = vst.msk [vmem:[%s221_s2 + $0x8] sm:$0xff] %vm15_vm0, %v120_v17 }
  0xde   :  { %v119_v18 = vld [vmem:[#allocation2] sm:$0xff] }
  0xdf   :  { %121 = vst.msk [vmem:[%s221_s2] sm:$0xff] %vm15_vm0, %v119_v18 }

// kernel: mlstm_layer_forward.9
= control target key start
LH: loop header
LB: loop body
LE: loop exit
PB: predicated region body
PF: predicated region fallthrough
CT: control target
= control target key end

     0   :  { %vm25_vm0 = vcmask 261120   ;;  %v249_v2 = vmov 0.0   ;;  %s337_s0 = inlined_call_operand.vmem [shape: f32[16,64], index: 0, kind: input, shape index: {}]   ;;  %s338_s1 = inlined_call_operand.vmem [shape: f32[16,64], index: 1, kind: input, shape index: {}]   ;;  %s339_s2 = inlined_call_operand.vmem [shape: f32[16,64], index: 2, kind: input, shape index: {}]   ;;  %s340_s3 = inlined_call_operand.vmem [shape: f32[1,64], index: 3, kind: input, shape index: {}]   ;;  %s341_s4 = inlined_call_operand.vmem [shape: f32[64,32], index: 4, kind: input, shape index: {}]   ;;  %s342_s5 = inlined_call_operand.hbm [shape: f32[16,32], index: 5, kind: output, shape index: {}]  }
   0x1   :  { %v70_v0 = vld [vmem:[%s341_s4 + $0x38] sm:$0xff]  ;;  %v69_v1 = vld [vmem:[%s341_s4 + $0x30] sm:$0xff]  ;;  %27 = vst.msk [vmem:[#allocation2 + $0x8] sm:$0xff] %vm25_vm0, %v249_v2  ;;  %26 = vst.msk [vmem:[#allocation2] sm:$0xff] %vm25_vm0, %v249_v2 }
   0x2   :  { %196 = vmatprep.subr.mxu0 %v70_v0  ;;  %v68_v3 = vld [vmem:[%s341_s4 + $0x28] sm:$0xff]  ;;  %v28_v4 = vld [vmem:[%s339_s2] sm:$0xff] }
   0x3   :  { %197 = vmatpush3.msra.mxu0 %v70_v0  ;;  %v182_v5 = vmul.f32 -1.442695, %v28_v4  ;;  %v67_v6 = vld [vmem:[%s341_s4 + $0x20] sm:$0xff]  ;;  %v29_v7 = vld [vmem:[%s339_s2 + $0x8] sm:$0xff] }
   0x4   :  { %198 = vmatprep.subr.mxu0 %v69_v1  ;;  %v183_v8 = vmul.f32 -1.442695, %v29_v7 }
   0x5   :  { %199 = vmatpush3.msra.mxu0 %v69_v1  ;;  %219 = vpow2.f32 %v182_v5 }
   0x6   :  { %200 = vmatprep.subr.mxu0 %v68_v3 }
   0x7   :  { %10 = vsyncpa [#allocation4], 0  ;;  %201 = vmatpush3.msra.mxu0 %v68_v3  ;;  %v66_v9 = vld [vmem:[%s341_s4 + $0x18] sm:$0xff]  ;;  %221 = vpow2.f32 %v183_v8  ;;  %v65_v10 = vld [vmem:[%s341_s4 + $0x10] sm:$0xff]  ;;  %vm71_vm1 = vcmask 523264  }
   0x8   :  { %202 = vmatprep.subr.mxu0 %v67_v6  ;;  %v64_v11 = vld [vmem:[%s341_s4 + $0x8] sm:$0xff]  ;;  %v63_v12 = vld [vmem:[%s341_s4] sm:$0xff] }
   0x9   :  { %203 = vmatpush3.msra.mxu0 %v67_v6  ;;  %v181_v17 = vld [vmem:[%s340_s3] ss:$0 sm:$0xff]  ;;  %v34_v19 = vld [vmem:[%s338_s1 + $0x8] sm:$0xff] }
   0xa   :  { %204 = vmatprep.subr.mxu0 %v66_v9  ;;  %v33_v18 = vld [vmem:[%s338_s1] sm:$0xff]  ;;  %v42_v22 = vmul.f32 %v181_v17, %v34_v19  ;;  %v31_v23 = vld [vmem:[%s337_s0 + $0x8] sm:$0xff] }
   0xb   :  { %205 = vmatpush3.msra.mxu0 %v66_v9  ;;  %v41_v20 = vmul.f32 %v181_v17, %v33_v18  ;;  %v30_v21 = vld [vmem:[%s337_s0] sm:$0xff]  ;;  %v62_v32 = vld [vmem:[#allocation2 + $0x8] sm:$0xff]  ;;  %s250_s0 = smov [#allocation3]  }
   0xc   :  { %206 = vmatprep.subr.mxu0 %v65_v10  ;;  %v44_v27 = vadd.f32 %v42_v22, %v31_v23  ;;  %v61_v34 = vld [vmem:[#allocation2] sm:$0xff]  ;;  %s170_s1 = sshll.u32 %s250_s0, 4  ;;  %s171_s1 = int_to_ptr.vmem [resolvable:$true] %s170_s1 }
   0xd   :  { %207 = vmatpush3.msra.mxu0 %v65_v10  ;;  %v43_v24 = vadd.f32 %v41_v20, %v30_v21  ;;  %s227_s3 = scalar_lea.vmem %s171_s1, 256  ;;  %p232_p1 = scmp.lt.s32.totalorder %s171_s1, %s171_s1 }
   0xe   :  { %208 = vmatprep.subr.mxu0 %v64_v11  ;;  %p228_p0 = scmp.ne.s32.totalorder %s171_s1, %s227_s3  ;;  %p233_p2 = scmp.lt.s32.totalorder %s227_s3, %s227_s3 }
   0xf   :  { %209 = vmatpush3.msra.mxu0 %v64_v11 }
  0x10   :  { %210 = vmatprep.subr.mxu0 %v63_v12  ;;  %p234_p3 = por %p233_p2, %p232_p1 }
  0x11   :  { %211 = vmatpush3.msra.mxu0 %v63_v12 }
  0x12   :  { %v220_v13 = vpop.eup %219  ;;  %p235_p4 = pnand %p234_p3, %p228_p0 }
  0x13   :  { %v51_v14 = vadd.f32 1.0, %v220_v13 }
  0x14   :  { %v222_v15 = vpop.eup %221 }
  0x15   :  { %223 = vrcp.f32 %v51_v14  ;;  %v52_v16 = vadd.f32 1.0, %v222_v15 }
  0x17   :  { %225 = vrcp.f32 %v52_v16 }
  0x22   :  { %v224_v25 = vpop.eup %223 }
  0x23   :  { %v57_v26 = vmul.f32 %v224_v25, %v28_v4 }
  0x24   :  { %v226_v28 = vpop.eup %225 }
  0x25   :  { %v59_v29 = vmul.f32 %v57_v26, %v43_v24  ;;  %v58_v30 = vmul.f32 %v226_v28, %v29_v7 }
  0x27   :  { %212 = vmatprep.mubr.msk.f32.mxu0 %vm71_vm1, %v59_v29  ;;  %v60_v31 = vmul.f32 %v58_v30, %v44_v27 }
  0x29   :  { %213 = vmatmul.mubr.msk.f32.vlgmr.msra.gmra.mxu0 %vm71_vm1, %v60_v31 }
  0xe9   :  { %v214_v33 = vpop.f32.mrf.mxu0 }
  0xea   :  { %v154_v35 = vadd.f32 %v214_v33, %v62_v32 }
  0xeb   :  { %v144_v36 = vpop.f32.mrf.mxu0 }
  0xec   :  { %157 = vst.msk [vmem:[#allocation2 + $0x8] sm:$0xff] %vm25_vm0, %v154_v35  ;;  %v153_v37 = vadd.f32 %v144_v36, %v61_v34 }
  0xee   :  { %156 = vst.msk [vmem:[#allocation2] sm:$0xff] %vm25_vm0, %v153_v37 }
  0xf3   :  { %v162_v38 = vld [vmem:[#allocation2 + $0x8] sm:$0xff] }
  0xf4   :  { %164 = vst.msk [vmem:[#allocation3 + $0x8] sm:$0xff] %vm25_vm0, %v162_v38 }
  0xf5   :  { %v161_v39 = vld [vmem:[#allocation2] sm:$0xff] }
  0xf6   :  { %163 = vst.msk [vmem:[#allocation3] sm:$0xff] %vm25_vm0, %v161_v39 }
  0xf7   :  { %238 = shalt.err (!%p235_p4)
}
  0xf8   :  { %s251_s21 = smov 128   ;;  %s252_s22 = smov 8  }
  0xf9   :  { %176 = dma.vmem_to_hbm [thread:$0]  %s171_s1, 256, %s342_s5, [#allocation4], %s251_s21, %s251_s21, %s252_s22  }
  0xfa   :  { %247 = dma.done.wait [#allocation4], 256  }
  0xfb   :  { %248 = vsyncadd [#allocation4], 4294967040 }
  0xfc   :  { %180 = vsyncpa [#allocation4], 1 }

// kernel: mlstm_layer_forward.8
= control target key start
LH: loop header
LB: loop body
LE: loop exit
PB: predicated region body
PF: predicated region fallthrough
CT: control target
= control target key end

     0   :  { %s1845_s9 = smov 0   ;;  %s1847_s10 = smov 0   ;;  %s2099_s0 = inlined_call_operand.<no memory space> [shape: s32[1], index: 0, kind: input, shape index: {}, may-alias: {0,1}]   ;;  %s2100_s1 = inlined_call_operand.<no memory space> [shape: s32[1], index: 1, kind: input, shape index: {}, may-alias: {0,1}]   ;;  %s2101_s2 = inlined_call_operand.vmem [shape: f32[2,8,64], index: 2, kind: input, shape index: {}]   ;;  %s2102_s3 = inlined_call_operand.vmem [shape: f32[2,8,64], index: 3, kind: input, shape index: {}]   ;;  %s2103_s4 = inlined_call_operand.vmem [shape: f32[2,8,64], index: 4, kind: input, shape index: {}]   ;;  %s2104_s5 = inlined_call_operand.vmem [shape: f32[2,4,8], index: 5, kind: input, shape index: {}]   ;;  %s2105_s6 = inlined_call_operand.vmem [shape: f32[2,8,4], index: 6, kind: input, shape index: {}]   ;;  %s2106_s7 = inlined_call_operand.vmem [shape: f32[1,64], index: 7, kind: input, shape index: {}]   ;;  %s2107_s8 = inlined_call_operand.vmem [shape: f32[2,8,64], index: 8, kind: output, shape index: {}]  }
   0x1   :  { %13 = sst [smem:[#allocation6]] %s2099_s0  ;;  %s1849_s11 = smov 0  }
   0x2   :  { %14 = sst [smem:[#allocation7]] %s2100_s1 }
   0x3 LB: > { %s32_s0 = sadd.s32 1, %s1767_s10  ;;  %p1577_p0 = scmp.ge.s32.totalorder %s1771_s11, 1  ;;  %s1771_s11 = sphi %s1849_s11, %s20_s11   ;;  %s1767_s10 = sphi %s1847_s10, %s2109_s10   ;;  %s1763_s9 = sphi %s1845_s9, %s2108_s9  }
   0x4   : > { %p34_p1 = scmp.ge.s32.totalorder %s32_s0, 2  ;;  %p312_p2 = scmp.lt.s32.totalorder %s1771_s11, 3 }
   0x6   : > { %s2111_s0 = smov (%p34_p1, %s32_s0), 0  ;;  %p313_p3 = pnand %p1577_p0, %p312_p2 }
   0x7   : > { %s1863_s1 = sld [smem:[#allocation6]] (!%p313_p3)  ;;  %p381_p4 = scmp.lt.s32.totalorder (!%p313_p3), %s1763_s9, 1 }
   0x8   : > { %316 = sbr.rel (%p313_p3) target bundleno = 3230 (0xc9e), region = 44  ;;  %s1865_s12 = sld [smem:[#allocation7]] (!%p313_p3) }
   0xd   : > { %s2113_s9 = smov (!%p381_p4, %s1763_s9), 1  ;;  %p383_p5 = scmp.lt.s32.totalorder %s1863_s1, 0 }
   0xe   : > { %p392_p6 = scmp.lt.s32.totalorder %s1865_s12, 0  ;;  %p1584_p7 = scmp.ne.s32.totalorder %s1865_s12, 0 }
   0xf   : > { %s384_s13 = scalar_select %p383_p5, %s1863_s1, 0 }
  0x10   : > { %s393_s14 = scalar_select %p392_p6, %s1865_s12, 0 }
  0x11   : > { %s385_s15 = sadd.s32 %s384_s13, %s2113_s9 }
  0x12   : > { %s1871_s16 = sshll.u32 %s385_s15, 3  ;;  %s394_s17 = sadd.s32 %s393_s14, %s2113_s9 }
  0x13   : > { %s387_s20 = scalar_lea.vmem %s2101_s2, %s1871_s16  ;;  %s1579_s21 = sshll.u32 %s394_s17, 3 }
  0x14   : > { %s396_s24 = scalar_lea.vmem %s2102_s3, %s1579_s21  ;;  %s1883_s27 = scalar_lea.vmem %s2103_s4, %s1579_s21 }
  0x15   : > { %s1581_s28 = sshll.u32 %s394_s17, 2  ;;  %s423_s13 = scalar_lea.vmem %s2105_s6, %s1871_s16 }
  0x16   : > { %s1892_s15 = scalar_lea.vmem %s2104_s5, %s1581_s28  ;;  %s432_s22 = scalar_lea.vmem %s2107_s8, %s1871_s16 }
  0x17   : > { %439 = sbr.rel (%p1584_p7) target bundleno = 31 (0x1f), region = 48 }
  0x1c   : > { %vm440_vm0 = vcmask 31744   ;;  %vm443_vm1 = vcmask 523264   ;;  %v1773_v0 = vmov -inf   ;;  %v1774_v1 = vmov 0.0  }
  0x1d   : > { %441 = vst.msk [vmem:[#allocation2] sm:$0xff] %vm440_vm0, %v1773_v0  ;;  %442 = vst.msk [vmem:[#allocation3] sm:$0xff] %vm440_vm0, %v1774_v1 }
  0x1e   : > { %444 = vst.msk [vmem:[#allocation4] sm:$0xff] %vm443_vm1, %v1774_v1 }
  0x1f PF: > { %v1899_v2 = vld [vmem:[%s423_s13] sm:$0xff]  ;;  %v1775_v3 = vmov 0   ;;  %vm481_vm2 = vcmask 130048   ;;  %v1776_v5 = vmov 0.0   ;;  %vm1777_vm3 = vmmov 0   ;;  %s1585_s23 = sshll.u32 %s1863_s1, 3  ;;  %p1599_p8 = scmp.ne.s32.totalorder %s1865_s12, %s1863_s1 }
  0x20   : > { %1704 = vset.pattern.permute.xlu0 %v1775_v3  ;;  %1705 = vset.pattern.permute.xlu1 %v1775_v3  ;;  %v446_v4 = vld [vmem:[%s396_s24] sm:$0xff]  ;;  %v451_v7 = vlaneseq  ;;  %s1586_s24 = sshll.u32 %s1865_s12, 3  ;;  %v453_v11 = vstv %s1585_s23  ;;  %vm473_vm5 = vcmask 64512   ;;  %v1778_v21 = vmov 3   ;;  %s1781_s25 = smov 96  }
  0x21   : > { %463 = vperm.xlu0 %1704, %v1899_v2   ;;  %1619 = vmatprep.subr.mxu0 %v1776_v5  ;;  %v445_v6 = vld [vmem:[%s387_s20] sm:$0xff]  ;;  %v458_v12 = vstv %s1586_s24  ;;  %v1779_v22 = vmov 1   ;;  %vm574_vm6 = vcmask 7168   ;;  %s1780_s20 = smov 112   ;;  %s1782_s26 = smov 80   ;;  %v1783_v30 = vmov 2  }
  0x22   : > { %1624 = vmatprep.subr.mxu1 %v1776_v5  ;;  %1620 = vmatpush3.xpose.msk.msra.mxu0 %vm481_vm2, %v446_v4  ;;  %v1920_v8 = vshrl.u32 %v451_v7, 7  ;;  %v457_v9 = vand.u32 127, %v451_v7  ;;  %v1926_v13 = vld [vmem:[%s1892_s15] sm:$0xf]  ;;  %vm771_vm7 = vcmask 15368   ;;  %vm977_vm8 = vcmask 23568  }
  0x23   : > { %1621 = vmatprep.mubr.msk.f32.mxu0 %vm1777_vm3, %v1776_v5  ;;  %1626 = vmatprep.mubr.msk.f32.mxu1 %vm1777_vm3, %v1776_v5  ;;  %v1958_v28 = vld [vmem:[%s1883_s27] sm:$0xff]  ;;  %vm1182_vm9 = vcmask 31768   ;;  %s1784_s27 = smov 16   ;;  %s1785_s28 = smov 32   ;;  %vm862_vm10 = vcmask 261248   ;;  %vm1067_vm11 = vcmask 392448  }
  0x24   : > { %1634 = vmatprep.subr.mxu0 %v1776_v5  ;;  %v468_v10 = vsub.s32 0, %v1920_v8  ;;  %v1929_v14 = vadd.s32 %v453_v11, %v1920_v8  ;;  %v1931_v15 = vadd.s32 %v458_v12, %v457_v9  ;;  %v1943_v23 = vld [vmem:[#allocation2] sm:$0xff]  ;;  %1625 = vmatpush3.msra.mxu1 %v1958_v28  ;;  %v665_v42 = vsub.s32 1, %v1920_v8  ;;  %s1786_s29 = smov 48   ;;  %s1789_s1 = smov (!%p1599_p8), 112  }
  0x25   : > { %1622 = vmatmul.mubr.msk.f32.vlgmr.msra.gmra.mxu0 %vm481_vm2, %v445_v6  ;;  %1708 = vset.pattern.permute.xlu0 %v1778_v21  ;;  %v1076_v44 = vsub.s32 3, %v1920_v8  ;;  %v871_v46 = vsub.s32 2, %v1920_v8  ;;  %vm1272_vm12 = vcmask 523648   ;;  %s1791_s12 = smov (!%p1599_p8), 96   ;;  %s1793_s30 = smov (!%p1599_p8), 80  }
  0x26   : > { %1636 = vmatprep.mubr.msk.f32.mxu0 %vm1777_vm3, %v1776_v5  ;;  %v469_v16 = vrot.slane %v1926_v13, %v468_v10  ;;  %vm460_vm4 = vcmp.ge.s32.totalorder %v1929_v14, %v1931_v15  ;;  %1629 = vmatprep.subr.mxu1 %v1776_v5  ;;  %v666_v45 = vrot.slane %v1926_v13, %v665_v42 }
  0x27   : > { %v1077_v48 = vrot.slane %v1926_v13, %v1076_v44  ;;  %v872_v51 = vrot.slane %v1926_v13, %v871_v46 }
  0x9c   : > { %v464_v17 = vpop.permute.xlu0 %463 }
  0x9d   : > { %v470_v18 = vadd.f32 %v469_v16, %v464_v17 }
  0x9f   : > { %v471_v19 = vsel %vm460_vm4, %v470_v18, -inf }
  0xa0   : > { %v474_v20 = vsel %vm473_vm5, %v471_v19, -inf }
  0xa1   : > { %475 = vmax.xlane.f32.xlu0 %v474_v20 }
  0xb7   : > { %1071 = vperm.xlu0 %1708, %v1899_v2  }
  0xbb   : > { %1709 = vset.pattern.permute.xlu0 %v1779_v22 }
  0xe5   : > { %v554_v27 = vpop.f32.mrf.mxu0 }
  0xe6   : > { %v558_v37 = vmul.f32 0.25, %v554_v27 }
  0xe7   : > { %v1623_v29 = vpop.f32.mrf.mxu0 }
 0x12a   : > { %v476_v24 = vpop.xlane.xlu0 %475 }
 0x12b   : > { %v1946_v25 = vmax.f32 %v1943_v23, %v476_v24 }
 0x12d   : > { %v478_v26 = vsub.f32 %v1943_v23, %v1946_v25  ;;  %658 = vst.msk [vmem:[#allocation2] sm:$0xff] %vm574_vm6, %v1946_v25  ;;  %561 = vperm.xlu1 %1705, %v1946_v25  }
 0x131   : > { %679 = vrot.lane.b32.xlu1 %v446_v4, %s1780_s20 }
 0x132   : > { %1706 = vset.pattern.permute.xlu1 %v1779_v22  ;;  %v1072_v50 = vpop.permute.xlu0 %1071 }
 0x133   : > { %v1078_v54 = vadd.f32 %v1077_v48, %v1072_v50 }
 0x134   : > { %v669_v61 = vld [vmem:[#allocation2] sm:$0xff] }
 0x135   : > { %677 = vrot.lane.b32.xlu1 %v445_v6, %s1780_s20  ;;  %v2007_v58 = vsel %vm460_vm4, %v1078_v54, -inf  ;;  %v568_v54 = vld [vmem:[#allocation3] sm:$0xff] }
 0x136   : > { %v1081_v60 = vsel %vm473_vm5, %v2007_v58, -inf }
 0x139   : > { %885 = vrot.lane.b32.xlu1 %v446_v4, %s1781_s25 }
 0x13d   : > { %883 = vrot.lane.b32.xlu1 %v445_v6, %s1781_s25 }
 0x141   : > { %1090 = vrot.lane.b32.xlu1 %v446_v4, %s1782_s26  ;;  %v479_v4 = vmul.f32 1.442695, %v478_v26 }
 0x145   : > { %1088 = vrot.lane.b32.xlu1 %v445_v6, %s1782_s26 }
 0x149   : > { %660 = vperm.xlu1 %1706, %v1899_v2  }
 0x14d   : > { %1707 = vset.pattern.permute.xlu1 %v1783_v30 }
 0x14e   : > { %866 = vperm.xlu1 %1707, %v1899_v2  }
 0x1a8   : > { %v562_v31 = vpop.permute.xlu1 %561 }
 0x1a9   : > { %v564_v32 = vsub.f32 %v471_v19, %v562_v31 }
 0x1ab   : > { %v565_v33 = vmul.f32 1.442695, %v564_v32 }
 0x1ac   : > { %v680_v34 = vpop.permute.xlu1 %679 }
 0x1ad   : > { %1716 = vpow2.f32 %v565_v33 }
 0x1ae   : > { %1718 = vpow2.f32 %v479_v4 }
 0x1b0   : > { %v678_v35 = vpop.permute.xlu1 %677 }
 0x1b4   : > { %v886_v36 = vpop.permute.xlu1 %885 }
 0x1b8   : > { %v884_v38 = vpop.permute.xlu1 %883 }
 0x1ba   : > { %v1717_v39 = vpop.eup %1716 }
 0x1bb   : > { %v1968_v40 = vmul.f32 %v1717_v39, %v558_v37  ;;  %v2032_v12 = vpop.eup %1718 }
 0x1bc   : > { %v1091_v41 = vpop.permute.xlu1 %1090 }
 0x1bd   : > { %1627 = vmatmul.mubr.msk.f32.vlgmr.msra.gmra.mxu1 %vm473_vm5, %v1968_v40 }
 0x1be   : > { %1630 = vmatpush3.xpose.msk.msra.mxu1 %vm481_vm2, %v680_v34  ;;  %1631 = vmatprep.mubr.msk.f32.mxu1 %vm1777_vm3, %v1776_v5 }
 0x1bf   : > { %1639 = vmatprep.subr.mxu1 %v1776_v5 }
 0x1c0   : > { %v1089_v43 = vpop.permute.xlu1 %1088 }
 0x1c1   : > { %1632 = vmatmul.mubr.msk.f32.vlgmr.msra.gmra.mxu1 %vm481_vm2, %v678_v35 }
 0x1c2   : > { %1640 = vmatpush3.xpose.msk.msra.mxu1 %vm481_vm2, %v886_v36  ;;  %1641 = vmatprep.mubr.msk.f32.mxu1 %vm1777_vm3, %v1776_v5 }
 0x1c3   : > { %1649 = vmatprep.subr.mxu1 %v1776_v5 }
 0x1c4   : > { %v661_v47 = vpop.permute.xlu1 %660 }
 0x1c5   : > { %v667_v49 = vadd.f32 %v666_v45, %v661_v47  ;;  %1642 = vmatmul.mubr.msk.f32.vlgmr.msra.gmra.mxu1 %vm481_vm2, %v884_v38 }
 0x1c6   : > { %1650 = vmatpush3.xpose.msk.msra.mxu1 %vm481_vm2, %v1091_v41  ;;  %1651 = vmatprep.mubr.msk.f32.mxu1 %vm1777_vm3, %v1776_v5  ;;  %v576_v41 = vld [vmem:[#allocation4] sm:$0xff] }
 0x1c7   : > { %v1994_v52 = vsel %vm460_vm4, %v667_v49, -inf }
 0x1c8   : > { %v670_v53 = vsel %vm473_vm5, %v1994_v52, -inf }
 0x1c9   : > { %671 = vmax.xlane.f32.xlu1 %v670_v53  ;;  %1652 = vmatmul.mubr.msk.f32.vlgmr.msra.gmra.mxu1 %vm481_vm2, %v1089_v43  ;;  %v867_v55 = vpop.permute.xlu1 %866 }
 0x1ca   : > { %v873_v56 = vadd.f32 %v872_v51, %v867_v55  ;;  %v569_v55 = vmul.f32 %v2032_v12, %v568_v54 }
 0x1cc   : > { %v2002_v57 = vsel %vm460_vm4, %v873_v56, -inf }
 0x1cd   : > { %v876_v59 = vsel %vm473_vm5, %v2002_v57, -inf }
 0x1ce   : > { %877 = vmax.xlane.f32.xlu1 %v876_v59 }
 0x1d2   : > { %1082 = vmax.xlane.f32.xlu1 %v1081_v60 }
 0x252   : > { %v672_v62 = vpop.xlane.xlu1 %671 }
 0x253   : > { %v673_v63 = vmax.f32 %v669_v61, %v672_v62 }
 0x255   : > { %864 = vst.msk [vmem:[#allocation2] sm:$0xff] %vm771_vm7, %v673_v63  ;;  %758 = vperm.xlu0 %1709, %v673_v63   ;;  %v674_v17 = vsub.f32 %v669_v61, %v673_v63 }
 0x257   : > { %v878_v0 = vpop.xlane.xlu1 %877  ;;  %v675_v20 = vmul.f32 1.442695, %v674_v17 }
 0x259   : > { %781 = vrot.lane.b32.xlu0 %v1958_v28, %s1780_s20 }
 0x25a   : > { %1710 = vset.pattern.permute.xlu0 %v1778_v21 }
 0x25b   : > { %v1083_v8 = vpop.xlane.xlu1 %1082 }
 0x25c   : > { %v875_v1 = vld [vmem:[#allocation2] sm:$0xff] }
 0x25d   : > { %v879_v2 = vmax.f32 %v875_v1, %v878_v0 }
 0x25f   : > { %1069 = vst.msk [vmem:[#allocation2] sm:$0xff] %vm977_vm8, %v879_v2  ;;  %964 = vperm.xlu1 %1707, %v879_v2   ;;  %v880_v6 = vsub.f32 %v875_v1, %v879_v2 }
 0x261   : > { %v881_v7 = vmul.f32 1.442695, %v880_v6 }
 0x263   : > { %986 = vrot.lane.b32.xlu1 %v1958_v28, %s1781_s25  ;;  %1720 = vpow2.f32 %v881_v7 }
 0x264   : > { %1712 = vset.pattern.permute.xlu1 %v1779_v22  ;;  %1722 = vpow2.f32 %v675_v20 }
 0x266   : > { %v2024_v9 = vld [vmem:[#allocation2] sm:$0xff] }
 0x267   : > { %v1084_v10 = vmax.f32 %v2024_v9, %v1083_v8 }
 0x269   : > { %v1085_v11 = vsub.f32 %v2024_v9, %v1084_v10  ;;  %1274 = vst.msk [vmem:[#allocation2] sm:$0xff] %vm1182_vm9, %v1084_v10  ;;  %1169 = vperm.xlu0 %1710, %v1084_v10  }
 0x26b   : > { %v1086_v47 = vmul.f32 1.442695, %v1085_v11 }
 0x26d   : > { %1191 = vrot.lane.b32.xlu0 %v1958_v28, %s1782_s26 }
 0x26e   : > { %1711 = vset.pattern.permute.xlu0 %v1775_v3  ;;  %v570_v3 = vsel %vm473_vm5, %v1968_v40, 0.0 }
 0x270   : > { %v2035_v13 = vpop.eup %1720 }
 0x271   : > { %579 = vperm.xlu0 %1711, %v2032_v12   ;;  %v1723_v25 = vpop.eup %1722 }
 0x275   : > { %1713 = vset.pattern.permute.xlu0 %v1783_v30 }
 0x276   : > { %982 = vperm.xlu0 %1713, %v2035_v13  }
 0x27a   : > { %1715 = vset.pattern.permute.xlu0 %v1778_v21 }
 0x27d   : > { %v652_v14 = vpop.f32.mrf.mxu1 }
 0x27f   : > { %v1628_v15 = vpop.f32.mrf.mxu1 }
 0x281   : > { %v751_v16 = vpop.f32.mrf.mxu1 }
 0x282   : > { %v755_v33 = vmul.f32 0.25, %v751_v16 }
 0x283   : > { %v1633_v18 = vpop.f32.mrf.mxu1 }
 0x285   : > { %v957_v19 = vpop.f32.mrf.mxu1 }
 0x286   : > { %v961_v42 = vmul.f32 0.25, %v957_v19 }
 0x287   : > { %v1643_v22 = vpop.f32.mrf.mxu1  ;;  %571 = vadd.xlane.f32.xlu1 %v570_v3 }
 0x289   : > { %v1162_v23 = vpop.f32.mrf.mxu1 }
 0x28a   : > { %v1166_v50 = vmul.f32 0.25, %v1162_v23 }
 0x28b   : > { %v1653_v24 = vpop.f32.mrf.mxu1 }
 0x298   : > { %776 = vperm.xlu1 %1712, %v1723_v25  }
 0x29c   : > { %1714 = vset.pattern.permute.xlu1 %v1778_v21 }
 0x2d0   : > { %v759_v26 = vpop.permute.xlu0 %758 }
 0x2d1   : > { %v761_v27 = vsub.f32 %v1994_v52, %v759_v26 }
 0x2d3   : > { %v762_v28 = vmul.f32 1.442695, %v761_v27 }
 0x2d4   : > { %v782_v29 = vpop.permute.xlu0 %781 }
 0x2d5   : > { %1724 = vpow2.f32 %v762_v28  ;;  %1635 = vmatpush3.msra.mxu0 %v782_v29 }
 0x2d6   : > { %1644 = vmatprep.subr.mxu0 %v1776_v5 }
 0x2da   : > { %v965_v30 = vpop.permute.xlu1 %964 }
 0x2db   : > { %v967_v31 = vsub.f32 %v2002_v57, %v965_v30 }
 0x2dd   : > { %v968_v32 = vmul.f32 1.442695, %v967_v31 }
 0x2de   : > { %v987_v36 = vpop.permute.xlu1 %986 }
 0x2df   : > { %1726 = vpow2.f32 %v968_v32 }
 0x2e2   : > { %v1725_v34 = vpop.eup %1724 }
 0x2e3   : > { %v764_v35 = vmul.f32 %v1725_v34, %v755_v33 }
 0x2e4   : > { %v1170_v37 = vpop.permute.xlu0 %1169 }
 0x2e5   : > { %v1172_v21 = vsub.f32 %v2007_v58, %v1170_v37  ;;  %1637 = vmatmul.mubr.msk.f32.vlgmr.msra.gmra.mxu0 %vm473_vm5, %v764_v35  ;;  %v767_v38 = vsel %vm473_vm5, %v764_v35, 0.0 }
 0x2e6   : > { %768 = vadd.xlane.f32.xlu0 %v767_v38  ;;  %1645 = vmatpush3.msra.mxu0 %v987_v36 }
 0x2e7   : > { %v1173_v39 = vmul.f32 1.442695, %v1172_v21  ;;  %1646 = vmatprep.mubr.msk.f32.mxu0 %vm1777_vm3, %v1776_v5  ;;  %1654 = vmatprep.subr.mxu0 %v1776_v5 }
 0x2e8   : > { %v1192_v40 = vpop.permute.xlu0 %1191 }
 0x2e9   : > { %1728 = vpow2.f32 %v1173_v39 }
 0x2ea   : > { %1730 = vpow2.f32 %v1086_v47 }
 0x2ec   : > { %v1727_v43 = vpop.eup %1726  ;;  %v580_v44 = vpop.permute.xlu0 %579 }
 0x2ed   : > { %v582_v45 = vmul.f32 %v580_v44, %v576_v41  ;;  %v970_v46 = vmul.f32 %v1727_v43, %v961_v42 }
 0x2ef   : > { %v656_v48 = vadd.f32 %v652_v14, %v582_v45  ;;  %1647 = vmatmul.mubr.msk.f32.vlgmr.msra.gmra.mxu0 %vm473_vm5, %v970_v46  ;;  %v973_v49 = vsel %vm473_vm5, %v970_v46, 0.0 }
 0x2f0   : > { %974 = vadd.xlane.f32.xlu1 %v973_v49  ;;  %1655 = vmatpush3.msra.mxu0 %v1192_v40 }
 0x2f1   : > { %657 = vst.msk [vmem:[#allocation4] sm:$0xff] %vm481_vm2, %v656_v48  ;;  %1656 = vmatprep.mubr.msk.f32.mxu0 %vm1777_vm3, %v1776_v5  ;;  %v983_v58 = vpop.permute.xlu0 %982 }
 0x2f6   : > { %v1729_v51 = vpop.eup %1728 }
 0x2f7   : > { %v1175_v52 = vmul.f32 %v1729_v51, %v1166_v50  ;;  %v1731_v53 = vpop.eup %1730 }
 0x2f8   : > { %v773_v12 = vld [vmem:[#allocation4] sm:$0xff] }
 0x2f9   : > { %1657 = vmatmul.mubr.msk.f32.vlgmr.msra.gmra.mxu0 %vm473_vm5, %v1175_v52  ;;  %v1178_v11 = vsel %vm473_vm5, %v1175_v52, 0.0 }
 0x301   : > { %1187 = vperm.xlu1 %1714, %v1731_v53  }
 0x310   : > { %v572_v56 = vpop.xlane.xlu1 %571 }
 0x311   : > { %v573_v57 = vadd.f32 %v572_v56, %v569_v55 }
 0x313   : > { %575 = vst.msk [vmem:[#allocation3] sm:$0xff] %vm574_vm6, %v573_v57 }
 0x314   : > { %v777_v62 = vpop.permute.xlu1 %776 }
 0x31a   : > { %v765_v59 = vld [vmem:[#allocation3] sm:$0xff] }
 0x31b   : > { %v766_v60 = vmul.f32 %v1723_v25, %v765_v59 }
 0x36f   : > { %v769_v61 = vpop.xlane.xlu0 %768 }
 0x370   : > { %v770_v5 = vadd.f32 %v769_v61, %v766_v60 }
 0x372   : > { %772 = vst.msk [vmem:[#allocation3] sm:$0xff] %vm771_vm7, %v770_v5 }
 0x379   : > { %v971_v63 = vld [vmem:[#allocation3] sm:$0xff]  ;;  %v975_v1 = vpop.xlane.xlu1 %974 }
 0x37a   : > { %v972_v0 = vmul.f32 %v2035_v13, %v971_v63  ;;  %v779_v13 = vmul.f32 %v777_v62, %v773_v12 }
 0x37c   : > { %v976_v2 = vadd.f32 %v975_v1, %v972_v0 }
 0x37d   : > { %v1188_v25 = vpop.permute.xlu1 %1187 }
 0x37e   : > { %978 = vst.msk [vmem:[#allocation3] sm:$0xff] %vm977_vm8, %v976_v2 }
 0x385   : > { %v1176_v20 = vld [vmem:[#allocation3] sm:$0xff] }
 0x386   : > { %v1177_v3 = vmul.f32 %v1731_v53, %v1176_v20 }
 0x3a5   : > { %v853_v4 = vpop.f32.mrf.mxu0 }
 0x3a6   : > { %858 = vrot.lane.b32.xlu0 %v853_v4, %s1784_s27 }
 0x3a7   : > { %v1638_v6 = vpop.f32.mrf.mxu0 }
 0x3af   : > { %v1058_v7 = vpop.f32.mrf.mxu0 }
 0x3b0   : > { %1063 = vrot.lane.b32.xlu0 %v1058_v7, %s1785_s28 }
 0x3b1   : > { %v1648_v8 = vpop.f32.mrf.mxu0 }
 0x3b9   : > { %v1263_v9 = vpop.f32.mrf.mxu0 }
 0x3bb   : > { %v1658_v10 = vpop.f32.mrf.mxu0 }
 0x3cf   : > { %1179 = vadd.xlane.f32.xlu0 %v1178_v11 }
 0x3e5   : > { %1268 = vrot.lane.b32.xlu0 %v1263_v9, %s1786_s29 }
 0x418   : > { %v859_v14 = vpop.permute.xlu0 %858 }
 0x419   : > { %v861_v15 = vadd.f32 %v859_v14, %v779_v13 }
 0x41b   : > { %863 = vst.msk [vmem:[#allocation4] sm:$0xff] %vm862_vm10, %v861_v15 }
 0x422   : > { %v979_v16 = vld [vmem:[#allocation4] sm:$0xff]  ;;  %v1064_v18 = vpop.permute.xlu0 %1063 }
 0x423   : > { %v985_v17 = vmul.f32 %v983_v58, %v979_v16 }
 0x425   : > { %v1066_v19 = vadd.f32 %v1064_v18, %v985_v17 }
 0x427   : > { %1068 = vst.msk [vmem:[#allocation4] sm:$0xff] %vm1067_vm11, %v1066_v19 }
 0x42e   : > { %v1184_v23 = vld [vmem:[#allocation4] sm:$0xff] }
 0x42f   : > { %v1190_v26 = vmul.f32 %v1188_v25, %v1184_v23 }
 0x458   : > { %v1180_v22 = vpop.xlane.xlu0 %1179 }
 0x459   : > { %v1181_v24 = vadd.f32 %v1180_v22, %v1177_v3 }
 0x45b   : > { %1183 = vst.msk [vmem:[#allocation3] sm:$0xff] %vm1182_vm9, %v1181_v24  ;;  %1278 = sbr.rel (%p1599_p8) target bundleno = 3230 (0xc9e), region = 52 }
 0x45c   : > { %v1269_v27 = vpop.permute.xlu0 %1268 }
 0x45d   : > { %v1271_v28 = vadd.f32 %v1269_v27, %v1190_v26 }
 0x45f   : > { %1273 = vst.msk [vmem:[#allocation4] sm:$0xff] %vm1272_vm12, %v1271_v28 }
 0x460   : > { %v1279_v29 = vld [vmem:[#allocation2] sm:$0xff]  ;;  %v1787_v30 = vmov 0   ;;  %v1788_v42 = vmov 1   ;;  %v1790_v58 = vmov 2   ;;  %v1792_v12 = vmov 3  }
 0x461   : > { %1732 = vset.pattern.permute.xlu0 %v1787_v30  ;;  %v1282_v31 = vsub.f32 0.0, %v1279_v29  ;;  %1733 = vset.pattern.permute.xlu1 %v1788_v42  ;;  %vm1433_vm13 = vcmask 523264  }
 0x462   : > { %v1280_v33 = vld [vmem:[#allocation3] sm:$0xff] }
 0x463   : > { %v1283_v32 = vmul.f32 1.442695, %v1282_v31  ;;  %v1281_v34 = vand.u32 2147483647, %v1280_v33 }
 0x465   : > { %1737 = vpow2.f32 %v1283_v32 }
 0x466   : > { %v1286_v38 = vld [vmem:[#allocation4] sm:$0xff] }
 0x472   : > { %v1738_v35 = vpop.eup %1737 }
 0x473   : > { %v1285_v36 = vmax.f32 %v1281_v34, %v1738_v35 }
 0x475   : > { %v1287_v37 = vadd.f32 1e-08, %v1285_v36 }
 0x477   : > { %1739 = vrcp.f32 %v1287_v37 }
 0x484   : > { %v1740_v21 = vpop.eup %1739 }
 0x485   : > { %1291 = vperm.xlu0 %1732, %v1740_v21  }
 0x489   : > { %1736 = vset.pattern.permute.xlu0 %v1792_v12 }
 0x500   : > { %v1292_v39 = vpop.permute.xlu0 %1291 }
 0x501   : > { %v1294_v40 = vmul.f32 %v1292_v39, %v1286_v38  ;;  %v1600_v39 = vld [vmem:[%s2106_s7] ss:$0 sm:$0xff] }
 0x503   : > { %v1295_v41 = vsel %vm481_vm2, %v1294_v40, 0.0 }
 0x504   : > { %1296 = vadd.xlane.f32.xlu0 %v1295_v41 }
 0x58d   : > { %v1297_v43 = vpop.xlane.xlu0 %1296 }
 0x58e   : > { %v1299_v44 = vmul.f32 0.0625, %v1297_v43 }
 0x590   : > { %v1300_v45 = vsub.f32 %v1294_v40, %v1299_v44 }
 0x592   : > { %v1301_v46 = vmul.f32 %v1300_v45, %v1300_v45 }
 0x594   : > { %v1302_v47 = vsel %vm481_vm2, %v1301_v46, 0.0 }
 0x595   : > { %1303 = vadd.xlane.f32.xlu1 %v1302_v47 }
 0x5a6   : > { %1322 = vperm.xlu1 %1733, %v1740_v21  }
 0x5aa   : > { %1734 = vset.pattern.permute.xlu1 %v1790_v58 }
 0x61e   : > { %v1304_v48 = vpop.xlane.xlu1 %1303 }
 0x61f   : > { %v1305_v49 = vmul.f32 0.0625, %v1304_v48 }
 0x621   : > { %v1306_v50 = vadd.f32 1e-05, %v1305_v49 }
 0x622   : > { %v1323_v53 = vpop.permute.xlu1 %1322 }
 0x623   : > { %1741 = vrsqrt.f32 %v1306_v50 }
 0x630   : > { %v1742_v51 = vpop.eup %1741 }
 0x631   : > { %v1308_v52 = vmul.f32 %v1742_v51, %v1300_v45 }
 0x633   : > { %1309 = vst.msk [vmem:[#allocation4] sm:$0xff] %vm481_vm2, %v1308_v52 }
 0x63a   : > { %v1317_v54 = vld [vmem:[#allocation4] sm:$0xff] }
 0x63b   : > { %v1325_v55 = vmul.f32 %v1323_v53, %v1317_v54 }
 0x63d   : > { %1327 = vrot.lane.b32.xlu1 %v1325_v55, %s1789_s1 }
 0x6af   : > { %v1328_v56 = vpop.permute.xlu1 %1327 }
 0x6b0   : > { %v1330_v57 = vsel %vm481_vm2, %v1328_v56, 0.0 }
 0x6b1   : > { %1331 = vadd.xlane.f32.xlu1 %v1330_v57 }
 0x6c2   : > { %1360 = vperm.xlu1 %1734, %v1740_v21  }
 0x6c6   : > { %1735 = vset.pattern.permute.xlu1 %v1792_v12 }
 0x73a   : > { %v1332_v59 = vpop.xlane.xlu1 %1331 }
 0x73b   : > { %v1333_v60 = vmul.f32 0.0625, %v1332_v59 }
 0x73d   : > { %v1334_v61 = vsub.f32 %v1325_v55, %v1333_v60 }
 0x73e   : > { %v1361_v7 = vpop.permute.xlu1 %1360 }
 0x73f   : > { %v1335_v5 = vmul.f32 %v1334_v61, %v1334_v61 }
 0x741   : > { %1337 = vrot.lane.b32.xlu0 %v1335_v5, %s1789_s1 }
 0x7b3   : > { %v1338_v62 = vpop.permute.xlu0 %1337 }
 0x7b4   : > { %v1340_v63 = vsel %vm481_vm2, %v1338_v62, 0.0 }
 0x7b5   : > { %1341 = vadd.xlane.f32.xlu0 %v1340_v63 }
 0x83e   : > { %v1342_v0 = vpop.xlane.xlu0 %1341 }
 0x83f   : > { %v1343_v1 = vmul.f32 0.0625, %v1342_v0 }
 0x841   : > { %v1344_v2 = vadd.f32 1e-05, %v1343_v1 }
 0x843   : > { %1743 = vrsqrt.f32 %v1344_v2 }
 0x850   : > { %v1744_v4 = vpop.eup %1743 }
 0x851   : > { %v1346_v6 = vmul.f32 %v1744_v4, %v1334_v61 }
 0x853   : > { %1347 = vst.msk [vmem:[#allocation4] sm:$0xff] %vm862_vm10, %v1346_v6 }
 0x85a   : > { %v1355_v8 = vld [vmem:[#allocation4] sm:$0xff] }
 0x85b   : > { %v1363_v9 = vmul.f32 %v1361_v7, %v1355_v8 }
 0x85d   : > { %1365 = vrot.lane.b32.xlu1 %v1363_v9, %s1791_s12 }
 0x8cf   : > { %v1366_v10 = vpop.permute.xlu1 %1365 }
 0x8d0   : > { %v1368_v11 = vsel %vm481_vm2, %v1366_v10, 0.0 }
 0x8d1   : > { %1369 = vadd.xlane.f32.xlu1 %v1368_v11 }
 0x8e2   : > { %1398 = vperm.xlu1 %1735, %v1740_v21  }
 0x95a   : > { %v1370_v13 = vpop.xlane.xlu1 %1369 }
 0x95b   : > { %v1371_v14 = vmul.f32 0.0625, %v1370_v13 }
 0x95d   : > { %v1372_v15 = vsub.f32 %v1363_v9, %v1371_v14 }
 0x95e   : > { %v1399_v24 = vpop.permute.xlu1 %1398 }
 0x95f   : > { %v1373_v16 = vmul.f32 %v1372_v15, %v1372_v15 }
 0x961   : > { %1375 = vrot.lane.b32.xlu0 %v1373_v16, %s1791_s12 }
 0x9d3   : > { %v1376_v17 = vpop.permute.xlu0 %1375 }
 0x9d4   : > { %v1378_v18 = vsel %vm481_vm2, %v1376_v17, 0.0 }
 0x9d5   : > { %1379 = vadd.xlane.f32.xlu0 %v1378_v18 }
 0xa5e   : > { %v1380_v19 = vpop.xlane.xlu0 %1379 }
 0xa5f   : > { %v1381_v20 = vmul.f32 0.0625, %v1380_v19 }
 0xa61   : > { %v1382_v3 = vadd.f32 1e-05, %v1381_v20 }
 0xa63   : > { %1745 = vrsqrt.f32 %v1382_v3 }
 0xa70   : > { %v1746_v22 = vpop.eup %1745 }
 0xa71   : > { %v1384_v23 = vmul.f32 %v1746_v22, %v1372_v15 }
 0xa73   : > { %1385 = vst.msk [vmem:[#allocation4] sm:$0xff] %vm1067_vm11, %v1384_v23 }
 0xa7a   : > { %v1393_v25 = vld [vmem:[#allocation4] sm:$0xff] }
 0xa7b   : > { %v1401_v26 = vmul.f32 %v1399_v24, %v1393_v25 }
 0xa7d   : > { %1403 = vrot.lane.b32.xlu1 %v1401_v26, %s1793_s30 }
 0xaef   : > { %v1404_v27 = vpop.permute.xlu1 %1403 }
 0xaf0   : > { %v1406_v28 = vsel %vm481_vm2, %v1404_v27, 0.0 }
 0xaf1   : > { %1407 = vadd.xlane.f32.xlu1 %v1406_v28 }
 0xb7a   : > { %v1408_v29 = vpop.xlane.xlu1 %1407 }
 0xb7b   : > { %v1409_v30 = vmul.f32 0.0625, %v1408_v29 }
 0xb7d   : > { %v1410_v31 = vsub.f32 %v1401_v26, %v1409_v30 }
 0xb7f   : > { %v1411_v32 = vmul.f32 %v1410_v31, %v1410_v31 }
 0xb81   : > { %1413 = vrot.lane.b32.xlu0 %v1411_v32, %s1793_s30 }
 0xbf3   : > { %v1414_v33 = vpop.permute.xlu0 %1413 }
 0xbf4   : > { %v1416_v34 = vsel %vm481_vm2, %v1414_v33, 0.0 }
 0xbf5   : > { %1417 = vadd.xlane.f32.xlu0 %v1416_v34 }
 0xc7e   : > { %v1418_v35 = vpop.xlane.xlu0 %1417 }
 0xc7f   : > { %v1419_v36 = vmul.f32 0.0625, %v1418_v35 }
 0xc81   : > { %v1420_v37 = vadd.f32 1e-05, %v1419_v36 }
 0xc83   : > { %1747 = vrsqrt.f32 %v1420_v37 }
 0xc90   : > { %v1748_v21 = vpop.eup %1747 }
 0xc91   : > { %v1422_v38 = vmul.f32 %v1748_v21, %v1410_v31 }
 0xc93   : > { %1423 = vst.msk [vmem:[#allocation4] sm:$0xff] %vm1272_vm12, %v1422_v38 }
 0xc9a   : > { %v1424_v40 = vld [vmem:[#allocation4] sm:$0xff] }
 0xc9b   : > { %v1432_v41 = vmul.f32 %v1600_v39, %v1424_v40 }
 0xc9d   : > { %1434 = vst.msk [vmem:[%s432_s22] sm:$0xff] %vm1433_vm13, %v1432_v41 }
 0xc9e PF: > { %s20_s11 = sadd.s32 1, %s1771_s11   ;;  %s2108_s9 = smov %s1767_s10 }
 0xc9f   : > { %p17_p9 = scmp.ge.s32.totalorder %s20_s11, 4   ;;  %s2109_s10 = smov %s2111_s0 }
 0xca1   :  { %19 = sbr.rel (!%p17_p9) target bundleno = 3 (0x3), region = 94 }

</bundles_post_ra>
